<compile_context>
chip_gen: v6e
topology: v6e:2x2x1
jax: 0.10.0
libtpu: 0.0.40
codegen_flags: <defaults>
</compile_context>

<pallas_src>
import functools

import jax
import jax.numpy as jnp
from jax.experimental import pallas as pl
from jax.experimental.pallas import tpu as pltpu

_BN_EPS = 1e-5
_HALO_BLK = 16          # small halo block (rows) for the dilated layers

_TDNN_LAYOUT = (("tdnn1", 5, 1), ("tdnn2", 3, 2), ("tdnn3", 2, 3),
                ("tdnn4", 1, 1), ("tdnn5", 1, 1))


@functools.lru_cache(maxsize=None)
def _hw_config():
    """(tile_t, vmem_limit_bytes) — bigger tiles / limit on 128 MiB VMEM parts."""
    try:
        vmem = int(getattr(pltpu.get_tpu_info(), "vmem_capacity_bytes", 64 << 20))
    except Exception:
        vmem = 64 << 20
    if vmem >= 100 * 1024 * 1024:          # v5e / v6e: 128 MiB physical VMEM
        return 512, 96 * 1024 * 1024
    return 256, 48 * 1024 * 1024           # v7x: 64 MiB physical VMEM


# ----------------------------------------------------------------------------
# Pallas kernels
# ----------------------------------------------------------------------------
def _linear_relu_bn_kernel(x_ref, w_ref, aff_ref, o_ref):
    """relu(x @ w + bias) * bn_scale + bn_shift on one (tile_t, K) tile."""
    aff = aff_ref[...]                                           # (3, C_out) f32
    y = jnp.dot(x_ref[...], w_ref[...], preferred_element_type=jnp.float32)
    y = jnp.maximum(y + aff[0:1, :], 0.0)                        # bias + ReLU
    y = y * aff[1:2, :] + aff[2:3, :]                            # eval-mode BN
    o_ref[...] = y.astype(o_ref.dtype)


def _tdnn_dilated_kernel(cur_ref, halo_ref, w_ref, aff_ref, o_ref, *,
                         context, dilation):
    """Dilated TDNN layer on one (batch, time-tile) grid cell.

    cur_ref:  (tile_t, C_in)        bf16  current time tile
    halo_ref: (_HALO_BLK, C_in)     bf16  first rows of the NEXT tile (halo)
    w_ref:    (context, C_in, C_out) bf16 per-tap weights
    aff_ref:  (3, C_out)            f32   [bias, bn_scale, bn_shift]
    o_ref:    (tile_t, C_out)       bf16
    """
    tile_t = cur_ref.shape[0]
    # One aligned bf16 concat; per-tap shifts are done on the f32 MXU outputs
    # (cheap sublane shifts) so the bf16 inputs never need an odd relayout.
    window = jnp.concatenate([cur_ref[...], halo_ref[...]], axis=0)
    acc = None
    for i in range(context):                                     # unrolled, <=3
        y = jnp.dot(window, w_ref[i], preferred_element_type=jnp.float32)
        off = i * dilation
        piece = y[off:off + tile_t, :]
        acc = piece if acc is None else acc + piece
    aff = aff_ref[...]
    out = jnp.maximum(acc + aff[0:1, :], 0.0) * aff[1:2, :] + aff[2:3, :]
    o_ref[...] = out.astype(o_ref.dtype)


def _tdnn45_pool_kernel(x_ref, w4_ref, a4_ref, w5_ref, a5_ref, o_ref,
                        sum_ref, sq_ref, *, tile_t, t_valid):
    """Fused tdnn4 -> tdnn5 -> masked statistics pooling over time."""
    ti = pl.program_id(1)

    @pl.when(ti == 0)
    def _():
        sum_ref[...] = jnp.zeros_like(sum_ref)
        sq_ref[...] = jnp.zeros_like(sq_ref)

    a4 = a4_ref[...]
    y = jnp.dot(x_ref[...], w4_ref[...], preferred_element_type=jnp.float32)
    y = jnp.maximum(y + a4[0:1, :], 0.0) * a4[1:2, :] + a4[2:3, :]
    a5 = a5_ref[...]
    y = jnp.dot(y.astype(jnp.bfloat16), w5_ref[...],
                preferred_element_type=jnp.float32)
    y = jnp.maximum(y + a5[0:1, :], 0.0) * a5[1:2, :] + a5[2:3, :]

    # mask rows beyond the valid sequence length (garbage rows -> 0)
    n_valid = t_valid - ti * tile_t
    row = jax.lax.broadcasted_iota(jnp.int32, y.shape, 0)
    y = jnp.where(row < n_valid, y, 0.0)
    sum_ref[...] += jnp.sum(y, axis=0, keepdims=True)
    sq_ref[...] += jnp.sum(y * y, axis=0, keepdims=True)

    @pl.when(ti == pl.num_programs(1) - 1)
    def _():
        s = sum_ref[...]
        mean = s / t_valid
        # unbiased variance (torch.std default); t_valid == 1 -> NaN like torch.
        var = (sq_ref[...] - s * mean) / (t_valid - 1)
        std = jnp.sqrt(jnp.maximum(var, 0.0))
        o_ref[...] = jnp.concatenate([mean, std], axis=1)


def _tail_kernel(p_ref, w6_ref, b6_ref, w7_ref, b7_ref, wo_ref, bo_ref,
                 xvec_ref, logits_ref):
    """segment6 -> segment7 -> output fused (bf16 weights, f32 accumulation)."""
    p = p_ref[...].astype(jnp.bfloat16)
    s6 = jnp.dot(p, w6_ref[...], preferred_element_type=jnp.float32) + b6_ref[...]
    xv = jnp.dot(s6.astype(jnp.bfloat16), w7_ref[...],
                 preferred_element_type=jnp.float32) + b7_ref[...]
    xvec_ref[...] = xv
    logits_ref[...] = (jnp.dot(xv.astype(jnp.bfloat16), wo_ref[...],
                               preferred_element_type=jnp.float32) + bo_ref[...])


# ----------------------------------------------------------------------------
# Wrappers (grid / BlockSpec plumbing)
# ----------------------------------------------------------------------------
def tdnn1_layer(u, w, aff, *, out_alloc_t, tile_t, vmem_limit):
    """u: (B, nt*tile_t, 5*C_in) bf16 unfolded input -> (B, out_alloc_t, 512)."""
    B, Tu, K = u.shape
    C_out = w.shape[1]
    nt = Tu // tile_t
    return pl.pallas_call(
        _linear_relu_bn_kernel,
        out_shape=jax.ShapeDtypeStruct((B, out_alloc_t, C_out), jnp.bfloat16),
        grid=(B, nt),
        in_specs=[
            pl.BlockSpec((None, tile_t, K), lambda b, t: (b, t, 0)),
            pl.BlockSpec((K, C_out), lambda b, t: (0, 0)),
            pl.BlockSpec((3, C_out), lambda b, t: (0, 0)),
        ],
        out_specs=pl.BlockSpec((None, tile_t, C_out), lambda b, t: (b, t, 0)),
        compiler_params=pltpu.CompilerParams(
            dimension_semantics=("parallel", "parallel"),
            vmem_limit_bytes=vmem_limit),
    )(u, w, aff)


def tdnn_dilated_layer(h, w_taps, aff, *, context, dilation, n_tiles,
                       out_alloc_t, tile_t, vmem_limit):
    """h: (B, A_in, C_in) bf16 with A_in >= n_tiles*tile_t + _HALO_BLK."""
    B, _, C_in = h.shape
    ctx, _, C_out = w_taps.shape
    hb = _HALO_BLK
    halo_stride = tile_t // hb
    kernel = functools.partial(_tdnn_dilated_kernel,
                               context=context, dilation=dilation)
    return pl.pallas_call(
        kernel,
        out_shape=jax.ShapeDtypeStruct((B, out_alloc_t, C_out), jnp.bfloat16),
        grid=(B, n_tiles),
        in_specs=[
            pl.BlockSpec((None, tile_t, C_in), lambda b, t: (b, t, 0)),
            # halo: first _HALO_BLK rows of the next tile (same array, 2nd spec)
            pl.BlockSpec((None, hb, C_in),
                         lambda b, t: (b, (t + 1) * halo_stride, 0)),
            pl.BlockSpec((ctx, C_in, C_out), lambda b, t: (0, 0, 0)),
            pl.BlockSpec((3, C_out), lambda b, t: (0, 0)),
        ],
        out_specs=pl.BlockSpec((None, tile_t, C_out), lambda b, t: (b, t, 0)),
        compiler_params=pltpu.CompilerParams(
            dimension_semantics=("parallel", "parallel"),
            vmem_limit_bytes=vmem_limit),
    )(h, h, w_taps, aff)


def tdnn45_stat_pool(h, w4, a4, w5, a5, *, t_valid, tile_t, vmem_limit):
    """h: (B, nt*tile_t, 512) bf16 -> (B, 1024) f32 = concat(mean_t, std_t)."""
    B, _, C_in = h.shape
    C = w5.shape[1]
    nt = pl.cdiv(t_valid, tile_t)
    kernel = functools.partial(_tdnn45_pool_kernel, tile_t=tile_t, t_valid=t_valid)
    out = pl.pallas_call(
        kernel,
        out_shape=jax.ShapeDtypeStruct((B, 1, 2 * C), jnp.float32),
        grid=(B, nt),
        in_specs=[
            pl.BlockSpec((None, tile_t, C_in), lambda b, t: (b, t, 0)),
            pl.BlockSpec((C_in, C), lambda b, t: (0, 0)),
            pl.BlockSpec((3, C), lambda b, t: (0, 0)),
            pl.BlockSpec((C, C), lambda b, t: (0, 0)),
            pl.BlockSpec((3, C), lambda b, t: (0, 0)),
        ],
        out_specs=pl.BlockSpec((None, 1, 2 * C), lambda b, t: (b, 0, 0)),
        scratch_shapes=[pltpu.VMEM((1, C), jnp.float32),
                        pltpu.VMEM((1, C), jnp.float32)],
        compiler_params=pltpu.CompilerParams(
            dimension_semantics=("parallel", "arbitrary"),
            vmem_limit_bytes=vmem_limit),
    )(h, w4, a4, w5, a5)
    return out.reshape(B, 2 * C)


def tail_linears(pooled, prep, *, num_classes):
    """segment6 -> segment7 -> output fused in one pallas_call (tiny M=B)."""
    B = pooled.shape[0]
    w6, b6 = prep["segment6"]["w"], prep["segment6"]["b"]
    w7, b7 = prep["segment7"]["w"], prep["segment7"]["b"]
    wo, bo = prep["output"]["w"], prep["output"]["b"]      # already lane-padded
    d7 = w7.shape[1]
    nc_pad = wo.shape[1]
    x_vec, logits = pl.pallas_call(
        _tail_kernel,
        out_shape=(jax.ShapeDtypeStruct((B, d7), jnp.float32),
                   jax.ShapeDtypeStruct((B, nc_pad), jnp.float32)),
        grid=(1,),
        in_specs=[
            pl.BlockSpec(pooled.shape, lambda i: (0, 0)),
            pl.BlockSpec(w6.shape, lambda i: (0, 0)),
            pl.BlockSpec(b6.shape, lambda i: (0, 0)),
            pl.BlockSpec(w7.shape, lambda i: (0, 0)),
            pl.BlockSpec(b7.shape, lambda i: (0, 0)),
            pl.BlockSpec(wo.shape, lambda i: (0, 0)),
            pl.BlockSpec(bo.shape, lambda i: (0, 0)),
        ],
        out_specs=(pl.BlockSpec((B, d7), lambda i: (0, 0)),
                   pl.BlockSpec((B, nc_pad), lambda i: (0, 0))),
        compiler_params=pltpu.CompilerParams(dimension_semantics=("arbitrary",)),
    )(pooled, w6, b6, w7, b7, wo, bo)
    return x_vec, logits[:, :num_classes]                   # drop lane padding


# ----------------------------------------------------------------------------
# One-time parameter preparation (layout / dtype / BN folding)
# ----------------------------------------------------------------------------
def _bn_aff(p):
    scale = p["gamma"] / jnp.sqrt(p["var"] + _BN_EPS)
    shift = p["beta"] - p["mean"] * scale
    return scale, shift


def prepare_params(params):
    """Prepare weights once in their kernel layout (not per forward call)."""
    prep = {}
    for name in ("tdnn1", "tdnn2", "tdnn3", "tdnn4", "tdnn5"):
        p = params[name]
        scale, shift = _bn_aff(p)
        aff = jnp.stack([p["b"], scale, shift], axis=0).astype(jnp.float32)
        w = jnp.transpose(p["w"], (2, 1, 0)).astype(jnp.bfloat16)  # (ctx,Cin,Cout)
        if name == "tdnn1":
            ctx, c_in, c_out = w.shape
            w = w.reshape(ctx * c_in, c_out)       # K-folded taps for the 40ch layer
        elif name in ("tdnn4", "tdnn5"):
            w = w[0]                               # context=1 -> (C_in, C_out)
        prep[name] = {"w": w, "aff": aff}
    for name in ("segment6", "segment7", "output"):
        p = params[name]
        w = p["w"].T.astype(jnp.bfloat16)
        b = p["b"].reshape(1, -1).astype(jnp.float32)
        if name == "output":
            nc = w.shape[1]
            nc_pad = ((nc + 127) // 128) * 128     # lane-dense classifier head
            w = jnp.pad(w, ((0, 0), (0, nc_pad - nc)))
            b = jnp.pad(b, ((0, 0), (0, nc_pad - nc)))
        prep[name] = {"w": w, "b": b}
    return prep


# ----------------------------------------------------------------------------
# Forward pass (mirrors XVector.forward in eval mode)
# ----------------------------------------------------------------------------
def xvector_forward(prep, x, x_lengths, *, num_classes=8):
    """x: (B, input_dim, T); x_lengths accepted but unused (as in the module)."""
    del x_lengths
    tile_t, vmem_limit = _hw_config()
    hb = _HALO_BLK
    B, c_in, T0 = x.shape

    # valid (un-padded) time extents after each context shrink
    t1 = T0 - 4                    # tdnn1: ctx5 dil1
    t2 = t1 - 4                    # tdnn2: ctx3 dil2
    t3 = t2 - 3                    # tdnn3: ctx2 dil3 (tdnn4/5 are context=1)
    assert t3 >= 1, "input too short for the TDNN receptive field"
    nt1 = pl.cdiv(t1, tile_t)
    nt2 = pl.cdiv(t2, tile_t)
    nt3 = pl.cdiv(t3, tile_t)

    # ---- tdnn1: unfold the 40-channel input in the wrapper (cheap), K=5*40 matmul
    xt = jnp.transpose(x, (0, 2, 1)).astype(jnp.bfloat16)        # (B, T0, C_in)
    l0 = nt1 * tile_t + 4
    if l0 > T0:                                                   # tiny pad, 40 ch only
        xt = jnp.pad(xt, ((0, 0), (0, l0 - T0), (0, 0)))
    u = jnp.concatenate([xt[:, i:i + nt1 * tile_t, :] for i in range(5)], axis=-1)
    h1 = tdnn1_layer(u, prep["tdnn1"]["w"], prep["tdnn1"]["aff"],
                     out_alloc_t=nt1 * tile_t + hb,
                     tile_t=tile_t, vmem_limit=vmem_limit)

    # ---- tdnn2 / tdnn3: dilated layers (tile + 16-row halo; no activation padding)
    h2 = tdnn_dilated_layer(h1, prep["tdnn2"]["w"], prep["tdnn2"]["aff"],
                            context=3, dilation=2, n_tiles=nt2,
                            out_alloc_t=nt2 * tile_t + hb,
                            tile_t=tile_t, vmem_limit=vmem_limit)
    h3 = tdnn_dilated_layer(h2, prep["tdnn3"]["w"], prep["tdnn3"]["aff"],
                            context=2, dilation=3, n_tiles=nt3,
                            out_alloc_t=nt3 * tile_t,
                            tile_t=tile_t, vmem_limit=vmem_limit)

    # ---- tdnn4 + tdnn5 + statistics pooling fused into one kernel
    # TODO(synk): single-pass E[x^2]-E[x]^2 in f32 can cancel if |mean| >> std.
    pooled = tdnn45_stat_pool(h3, prep["tdnn4"]["w"], prep["tdnn4"]["aff"],
                              prep["tdnn5"]["w"], prep["tdnn5"]["aff"],
                              t_valid=t3, tile_t=tile_t, vmem_limit=vmem_limit)

    # ---- segment6 -> segment7 -> output fused; softmax in JAX (8 classes)
    x_vec, output = tail_linears(pooled, prep, num_classes=num_classes)
    predictions = jax.nn.softmax(output, axis=1)
    return output, predictions, x_vec


# ----------------------------------------------------------------------------
# Pure-JAX f32 reference (same math, for a loose sanity check)
# ----------------------------------------------------------------------------
def _reference_forward(params, x):
    def tdnn_ref(h, p, ctx, dil):
        T_out = h.shape[2] - dil * (ctx - 1)
        taps = jnp.transpose(p["w"], (2, 1, 0))                  # (ctx, C_in, C_out)
        y = jnp.zeros((h.shape[0], T_out, taps.shape[-1]), jnp.float32)
        for i in range(ctx):
            y = y + jnp.einsum("bct,cd->btd", h[:, :, i * dil:i * dil + T_out], taps[i])
        y = jnp.maximum(y + p["b"][None, None, :], 0.0)
        scale, shift = _bn_aff(p)
        y = y * scale[None, None, :] + shift[None, None, :]
        return jnp.transpose(y, (0, 2, 1))                       # back to (B, C, T)

    h = x
    for name, ctx, dil in _TDNN_LAYOUT:
        h = tdnn_ref(h, params[name], ctx, dil)
    mean = jnp.mean(h, axis=2)
    var = jnp.sum((h - mean[:, :, None]) ** 2, axis=2) / (h.shape[2] - 1)
    pooled = jnp.concatenate([mean, jnp.sqrt(var)], axis=1)
    s6 = pooled @ params["segment6"]["w"].T + params["segment6"]["b"]
    xv = s6 @ params["segment7"]["w"].T + params["segment7"]["b"]
    out = xv @ params["output"]["w"].T + params["output"]["b"]
    return out, jax.nn.softmax(out, axis=1), xv


# ----------------------------------------------------------------------------
# Deterministic parameter init (synthetic, matches module shapes)
# ----------------------------------------------------------------------------
def init_params(key, input_dim=40, num_classes=8):
    tdnn_cfg = [
        (input_dim, 512, 5),
        (512, 512, 3),
        (512, 512, 2),
        (512, 512, 1),
        (512, 512, 1),
    ]
    keys = jax.random.split(key, 2 * len(tdnn_cfg) + 6)
    params = {}
    k = 0
    for n, (cin, cout, ctx) in enumerate(tdnn_cfg, start=1):
        params[f"tdnn{n}"] = dict(
            w=0.05 * jax.random.normal(keys[k], (cout, cin, ctx), jnp.float32),
            b=0.05 * jax.random.normal(keys[k + 1], (cout,), jnp.float32),
            gamma=jnp.ones((cout,), jnp.float32),
            beta=jnp.zeros((cout,), jnp.float32),
            mean=jnp.zeros((cout,), jnp.float32),
            var=jnp.ones((cout,), jnp.float32),
        )
        k += 2
    for name, (nin, nout) in [("segment6", (1024, 512)),
                              ("segment7", (512, 512)),
                              ("output", (512, num_classes))]:
        params[name] = dict(
            w=0.05 * jax.random.normal(keys[k], (nout, nin), jnp.float32),
            b=0.05 * jax.random.normal(keys[k + 1], (nout,), jnp.float32),
        )
        k += 2
    return params


if __name__ == "__main__":
    B, F, T = 2, 40, 24          # time shrinks by 11 across the TDNN stack -> T5 = 13
    key = jax.random.PRNGKey(0)
    kx, kp = jax.random.split(key)
    x = jax.random.normal(kx, (B, F, T), jnp.float32)
    x_lengths = jnp.full((B,), T, jnp.int32)   # accepted but unused by the forward

    params = init_params(kp, input_dim=F, num_classes=8)
    prep = prepare_params(params)              # one-time weight layout preparation
    output, predictions, x_vec = xvector_forward(prep, x, x_lengths, num_classes=8)
    jax.block_until_ready((output, predictions, x_vec))

    assert output.shape == (B, 8)
    assert predictions.shape == (B, 8)
    assert x_vec.shape == (B, 512)
    assert bool(jnp.all(jnp.isfinite(output)))
    assert bool(jnp.allclose(jnp.sum(predictions, axis=1), 1.0, atol=1e-3))

    # loose check against the pure-JAX f32 reference (kernel matmuls run in bf16)
    ref_out, ref_pred, ref_xvec = _reference_forward(params, x)
    assert bool(jnp.max(jnp.abs(output - ref_out)) < 0.15)
    assert bool(jnp.max(jnp.abs(predictions - ref_pred)) < 0.05)
    assert bool(jnp.max(jnp.abs(x_vec - ref_xvec)) < 0.15)

    print("KERNEL_OK")
</pallas_src>

<mosaic_0001>
module attributes {stable_mosaic.version = 11 : i64} {
  func.func @_linear_relu_bn_kernel(%arg0: i32, %arg1: i32, %arg2: memref<1x256x200xbf16, #tpu.memory_space<vmem>>, %arg3: memref<200x512xbf16, #tpu.memory_space<vmem>>, %arg4: memref<3x512xf32, #tpu.memory_space<vmem>>, %arg5: memref<1x256x512xbf16, #tpu.memory_space<vmem>>) attributes {dimension_semantics = [#tpu.dimension_semantics<parallel>, #tpu.dimension_semantics<parallel>], iteration_bounds = array<i64: 2, 1>, scalar_prefetch = 0 : i64, scratch_operands = 0 : i64, tpu.core_type = #tpu.core_type<tc>, window_params = [{transform_indices = @transform_0, window_bounds = array<i64: 1, 256, 200>}, {pipeline_mode = #tpu.pipeline_mode<synchronous>, transform_indices = @transform_1, window_bounds = array<i64: 200, 512>}, {pipeline_mode = #tpu.pipeline_mode<synchronous>, transform_indices = @transform_2, window_bounds = array<i64: 3, 512>}, {transform_indices = @transform_3, window_bounds = array<i64: 1, 256, 512>}]} {
    %c0 = arith.constant 0 : index
    %c0_0 = arith.constant 0 : index
    %0 = vector.load %arg4[%c0, %c0_0] : memref<3x512xf32, #tpu.memory_space<vmem>>, vector<3x512xf32>
    %c0_1 = arith.constant 0 : index
    %c0_2 = arith.constant 0 : index
    %c0_3 = arith.constant 0 : index
    %1 = vector.load %arg2[%c0_1, %c0_2, %c0_3] : memref<1x256x200xbf16, #tpu.memory_space<vmem>>, vector<1x256x200xbf16>
    %2 = vector.shape_cast %1 : vector<1x256x200xbf16> to vector<256x200xbf16>
    %c0_4 = arith.constant 0 : index
    %c0_5 = arith.constant 0 : index
    %3 = vector.load %arg3[%c0_4, %c0_5] : memref<200x512xbf16, #tpu.memory_space<vmem>>, vector<200x512xbf16>
    %cst = arith.constant dense<0.000000e+00> : vector<256x512xf32>
    %4 = tpu.matmul %2, %3, %cst {dimension_numbers = #tpu.dot_dimension_numbers<[1], [0], [0], [1], [0, 0, 1, 1], [], []>} : vector<256x200xbf16>, vector<200x512xbf16>, vector<256x512xf32> -> vector<256x512xf32>
    %5 = vector.extract_strided_slice %0 {offsets = [0, 0], sizes = [1, 512], strides = [1, 1]} : vector<3x512xf32> to vector<1x512xf32>
    %6 = vector.broadcast %5 : vector<1x512xf32> to vector<256x512xf32>
    %7 = arith.addf %4, %6 : vector<256x512xf32>
    %cst_6 = arith.constant 0.000000e+00 : f32
    %8 = vector.broadcast %cst_6 : f32 to vector<256x512xf32>
    %9 = arith.maximumf %7, %8 : vector<256x512xf32>
    %10 = vector.extract_strided_slice %0 {offsets = [1, 0], sizes = [1, 512], strides = [1, 1]} : vector<3x512xf32> to vector<1x512xf32>
    %11 = vector.broadcast %10 : vector<1x512xf32> to vector<256x512xf32>
    %12 = arith.mulf %9, %11 : vector<256x512xf32>
    %13 = vector.extract_strided_slice %0 {offsets = [2, 0], sizes = [1, 512], strides = [1, 1]} : vector<3x512xf32> to vector<1x512xf32>
    %14 = vector.broadcast %13 : vector<1x512xf32> to vector<256x512xf32>
    %15 = arith.addf %12, %14 : vector<256x512xf32>
    %16 = arith.truncf %15 : vector<256x512xf32> to vector<256x512xbf16>
    %c0_7 = arith.constant 0 : index
    %c0_8 = arith.constant 0 : index
    %c0_9 = arith.constant 0 : index
    %17 = vector.load %arg5[%c0_7, %c0_8, %c0_9] : memref<1x256x512xbf16, #tpu.memory_space<vmem>>, vector<1x256x512xbf16>
    %18 = vector.shape_cast %17 : vector<1x256x512xbf16> to vector<256x512xbf16>
    %19 = vector.shape_cast %16 : vector<256x512xbf16> to vector<1x256x512xbf16>
    tpu.vector_store %arg5[%c0_7, %c0_8, %c0_9], %19 {strides = array<i32>} : memref<1x256x512xbf16, #tpu.memory_space<vmem>>, vector<1x256x512xbf16>,
    return
  }
  func.func @transform_0(%arg0: i32, %arg1: i32) -> (i32, i32, i32) {
    %c0_i32 = arith.constant 0 : i32
    %c0_i32_0 = arith.constant 0 : i32
    return %arg0, %arg1, %c0_i32 : i32, i32, i32
  }
  func.func @transform_1(%arg0: i32, %arg1: i32) -> (i32, i32) {
    %c0_i32 = arith.constant 0 : i32
    %c0_i32_0 = arith.constant 0 : i32
    %c0_i32_1 = arith.constant 0 : i32
    return %c0_i32, %c0_i32_0 : i32, i32
  }
  func.func @transform_2(%arg0: i32, %arg1: i32) -> (i32, i32) {
    %c0_i32 = arith.constant 0 : i32
    %c0_i32_0 = arith.constant 0 : i32
    %c0_i32_1 = arith.constant 0 : i32
    return %c0_i32, %c0_i32_0 : i32, i32
  }
  func.func @transform_3(%arg0: i32, %arg1: i32) -> (i32, i32, i32) {
    %c0_i32 = arith.constant 0 : i32
    %c0_i32_0 = arith.constant 0 : i32
    return %arg0, %arg1, %c0_i32 : i32, i32, i32
  }
}

</mosaic_0001>

<bundles_post_ra>
// kernel: tpu_custom_call.1
= control target key start
LH: loop header
LB: loop body
LE: loop exit
PB: predicated region body
PF: predicated region fallthrough
CT: control target
= control target key end

     0   :  { %8 = vsyncpa [#allocation3], 0  ;;  %s3618_s0 = inlined_call_operand.vmem [shape: bf16[2,256,200], index: 0, kind: input, shape index: {}]   ;;  %s3619_s1 = inlined_call_operand.vmem [shape: bf16[200,512], index: 1, kind: input, shape index: {}]   ;;  %s3620_s2 = inlined_call_operand.vmem [shape: f32[3,512], index: 2, kind: input, shape index: {}]   ;;  %s3621_s3 = inlined_call_operand.hbm [shape: bf16[2,272,512], index: 3, kind: output, shape index: {}]  }
   0x1   :  { %10 = vsyncpa [#allocation3 + $0x1], 0  ;;  %s2725_s12 = smov 0   ;;  %s2727_s13 = smov 0  }
   0x2   :  { %s2729_s14 = smov 0   ;;  %s2731_s15 = smov 0  }
   0x3   :  { %s2733_s16 = smov 0   ;;  %s2735_s17 = smov 0  }
   0x4 LB: > { %s2183_s18 = sadd.s32 4294967295, %s2700_s17   ;;  %s2184_s19 = sadd.s32 4294967294, %s2700_s17   ;;  %s2700_s17 = sphi %s2735_s17, %s16_s17   ;;  %s2696_s16 = sphi %s2733_s16, %s3628_s16   ;;  %s2692_s15 = sphi %s2731_s15, %s3627_s15   ;;  %s2688_s14 = sphi %s2729_s14, %s3626_s14   ;;  %s2684_s13 = sphi %s2727_s13, %s3625_s13   ;;  %s2680_s12 = sphi %s2725_s12, %s3624_s12  }
   0x5   : > { %s28_s20 = sadd.s32 1, %s2696_s16  ;;  %s107_s21 = sadd.s32 1, %s2688_s14 }
   0x6   : > { %p30_p0 = scmp.ge.s32.totalorder %s28_s20, 2  ;;  %p117_p1 = scmp.ne.s32.totalorder %s2688_s14, %s2684_s13 }
   0x7   : > { %p118_p2 = scmp.eq.s32.totalorder %s2183_s18, 1  ;;  %p123_p3 = scmp.ne.s32.totalorder %s2684_s13, %s2680_s12 }
   0x8   : > { %s3630_s20 = smov (%p30_p0, %s28_s20), 0  ;;  %p124_p5 = scmp.eq.s32.totalorder %s2184_s19, 1 }
   0x9   : > { %p2765_p4 = por %p118_p2, %p117_p1  ;;  %s102_s23 = ssub.s32 %s2696_s16, %s3630_s20 }
   0xa   : > { %p2187_p6 = scmp.ge.s32.totalorder %s2700_s17, 1  ;;  %p105_p7 = scmp.eq.s32.totalorder %s102_s23, 0 }
   0xb   : > { %p2772_p8 = por %p124_p5, %p123_p3  ;;  %p162_p9 = scmp.lt.s32.totalorder %s2700_s17, 3 }
   0xc   : > { %s2778_s25 = scalar_select %p105_p7, %s2688_s14, %s107_s21  }
   0xd   : > { %p163_p10 = pnand %p2187_p6, %p162_p9 }
   0xe   : > { %p192_p11 = scmp.lt.s32.totalorder (!%p163_p10), %s2692_s15, 1  ;;  %s2442_s10 = smul.u32 (!%p163_p10), 8704, %s2692_s15 }
   0xf   : > { %166 = sbr.rel (%p163_p10) target bundleno = 432 (0x1b0), region = 32  ;;  %s2702_s26 = smov (!%p163_p10), [#allocation2]  }
  0x10   : > { %s3565_s19 = scalar_lea.hbm (!%p163_p10), %s3621_s3, %s2442_s10 }
  0x14   : > { %v2500_v0 = vld [vmem:[%s3619_s1 + $0xe4] ss:$16 sps:$4 sm:$0xff]   ;;  %v2502_v1 = vld [vmem:[%s3619_s1 + $0xec] ss:$16 sps:$4 sm:$0xff]   ;;  %v2504_v2 = vld [vmem:[%s3619_s1 + $0xe0] ss:$16 sps:$4 sm:$0xff]  }
  0x15   : > { %787 = vmatprep.subr.bf16.mxu0 %v2500_v0  ;;  %v2505_v3 = vld [vmem:[%s3619_s1 + $0xe8] ss:$16 sps:$4 sm:$0xff]   ;;  %980 = vmatprep.subr.bf16.mxu1 %v2502_v1  ;;  %v2506_v4 = vld [vmem:[%s3619_s1 + $0xc4] ss:$16 sps:$4 sm:$0xff]   ;;  %v2508_v5 = vld [vmem:[%s3619_s1 + $0xcc] ss:$16 sps:$4 sm:$0xff]  }
  0x16   : > { %788 = vmatpush1.bf16.msra.mxu0 %v2504_v2  ;;  %981 = vmatpush1.bf16.msra.mxu1 %v2505_v3  ;;  %v2510_v6 = vld [vmem:[%s3619_s1 + $0xc0] ss:$16 sps:$4 sm:$0xff]   ;;  %v2511_v7 = vld [vmem:[%s3619_s1 + $0xc8] ss:$16 sps:$4 sm:$0xff]   ;;  %v2512_v8 = vld [vmem:[%s3619_s1 + $0xa4] ss:$16 sps:$4 sm:$0xff]  }
  0x17   : > { %789 = vmatprep.subr.bf16.mxu0 %v2506_v4  ;;  %982 = vmatprep.subr.bf16.mxu1 %v2508_v5  ;;  %v2514_v9 = vld [vmem:[%s3619_s1 + $0xac] ss:$16 sps:$4 sm:$0xff]   ;;  %v2516_v10 = vld [vmem:[%s3619_s1 + $0xa0] ss:$16 sps:$4 sm:$0xff]   ;;  %v2517_v11 = vld [vmem:[%s3619_s1 + $0xa8] ss:$16 sps:$4 sm:$0xff]  }
  0x18   : > { %v2518_v12 = vld [vmem:[%s3619_s1 + $0x84] ss:$16 sps:$4 sm:$0xff]   ;;  %v2520_v13 = vld [vmem:[%s3619_s1 + $0x8c] ss:$16 sps:$4 sm:$0xff]   ;;  %v2522_v14 = vld [vmem:[%s3619_s1 + $0x80] ss:$16 sps:$4 sm:$0xff]  }
  0x19   : > { %v2523_v15 = vld [vmem:[%s3619_s1 + $0x88] ss:$16 sps:$4 sm:$0xff]   ;;  %v2524_v16 = vld [vmem:[%s3619_s1 + $0x64] ss:$16 sps:$4 sm:$0xff]   ;;  %v2526_v17 = vld [vmem:[%s3619_s1 + $0x6c] ss:$16 sps:$4 sm:$0xff]  }
  0x1a   : > { %790 = vmatpush1.bf16.msra.mxu0 %v2510_v6  ;;  %983 = vmatpush1.bf16.msra.mxu1 %v2511_v7  ;;  %v2528_v18 = vld [vmem:[%s3619_s1 + $0x60] ss:$16 sps:$4 sm:$0xff]   ;;  %v2529_v19 = vld [vmem:[%s3619_s1 + $0x68] ss:$16 sps:$4 sm:$0xff]   ;;  %v2530_v20 = vld [vmem:[%s3619_s1 + $0x44] ss:$16 sps:$4 sm:$0xff]  }
  0x1b   : > { %791 = vmatprep.subr.bf16.mxu0 %v2512_v8  ;;  %984 = vmatprep.subr.bf16.mxu1 %v2514_v9  ;;  %v2532_v21 = vld [vmem:[%s3619_s1 + $0x4c] ss:$16 sps:$4 sm:$0xff]   ;;  %v2534_v22 = vld [vmem:[%s3619_s1 + $0x40] ss:$16 sps:$4 sm:$0xff]   ;;  %v2535_v23 = vld [vmem:[%s3619_s1 + $0x48] ss:$16 sps:$4 sm:$0xff]  }
  0x1c   : > { %v2536_v24 = vld [vmem:[%s3619_s1 + $0x24] ss:$16 sps:$4 sm:$0xff]   ;;  %v2538_v25 = vld [vmem:[%s3619_s1 + $0x2c] ss:$16 sps:$4 sm:$0xff]   ;;  %v2540_v26 = vld [vmem:[%s3619_s1 + $0x20] ss:$16 sps:$4 sm:$0xff]  }
  0x1d   : > { %s193_s29 = scalar_select %p192_p11, %s2692_s15, 1  ;;  %v2541_v27 = vld [vmem:[%s3619_s1 + $0x28] ss:$16 sps:$4 sm:$0xff]   ;;  %v2542_v28 = vld [vmem:[%s3619_s1 + $0x4] ss:$16 sps:$4 sm:$0xff]   ;;  %vm774_vm0 = vcmask 1043456  }
  0x1e   : > { %792 = vmatpush1.bf16.msra.mxu0 %v2516_v10  ;;  %985 = vmatpush1.bf16.msra.mxu1 %v2517_v11  ;;  %v2544_v29 = vld [vmem:[%s3619_s1 + $0xc] ss:$16 sps:$4 sm:$0xff]   ;;  %v291_v30 = vld [vmem:[%s3619_s1 + $0x180] sm:$0xff]  ;;  %v2547_v33 = vld [vmem:[%s3619_s1 + $0x8] ss:$16 sps:$4 sm:$0xff]   ;;  %vm725_vm1 = vcmask 588800  }
  0x1f   : > { %793 = vmatprep.subr.bf16.mxu0 %v2518_v12  ;;  %986 = vmatprep.subr.bf16.mxu1 %v2520_v13  ;;  %v292_v31 = vld [vmem:[%s3619_s1 + $0x188] sm:$0xff]  ;;  %v2546_v32 = vld [vmem:[%s3619_s1] ss:$16 sps:$4 sm:$0xff]   ;;  %v2272_v34 = vcombine.high %v291_v30, %v291_v30  ;;  %s2377_s27 = sshll.u32 %s193_s29, 8  ;;  %v2271_v36 = vcombine.low %v291_v30, %v291_v30  ;;  %v2552_v38 = vld [vmem:[%s3619_s1 + $0x164] ss:$16 sps:$4 sm:$0xff]  }
  0x20   : > { %v2274_v35 = vcombine.high %v292_v31, %v292_v31  ;;  %v2273_v37 = vcombine.low %v292_v31, %v292_v31  ;;  %s2887_s4 = scalar_lea.vmem %s3618_s0, %s2377_s27  ;;  %v2554_v41 = vld [vmem:[%s3619_s1 + $0x16c] ss:$16 sps:$4 sm:$0xff]   ;;  %v2556_v43 = vld [vmem:[%s3619_s1 + $0x160] ss:$16 sps:$4 sm:$0xff]   ;;  %v2557_v44 = vld [vmem:[%s3619_s1 + $0x168] ss:$16 sps:$4 sm:$0xff]  }
  0x21   : > { %v776_v39 = vsel %vm774_vm0, %v2271_v36, 0  ;;  %v2578_v42 = vld [vmem:[%s2887_s4 + $0x4] ss:$8 sps:$4 sm:$0xff]   ;;  %v2562_v47 = vld [vmem:[%s3619_s1 + $0x140] ss:$16 sps:$4 sm:$0xff]   ;;  %s2628_s27 = sshll.u32 %s2702_s26, 4  ;;  %s2629_s27 = int_to_ptr.vmem [resolvable:$false] %s2628_s27 }
  0x22   : > { %794 = vmatpush1.bf16.msra.mxu0 %v2522_v14  ;;  %987 = vmatpush1.bf16.msra.mxu1 %v2523_v15  ;;  %v782_v40 = vsel %vm774_vm0, %v2273_v37, 0  ;;  %v2558_v45 = vld [vmem:[%s3619_s1 + $0x144] ss:$16 sps:$4 sm:$0xff]   ;;  %v2560_v46 = vld [vmem:[%s3619_s1 + $0x14c] ss:$16 sps:$4 sm:$0xff]   ;;  %s2630_s28 = scalar_lea.vmem %s2629_s27, 16384 }
  0x23   : > { %795 = vmatprep.subr.bf16.mxu0 %v2524_v16  ;;  %988 = vmatprep.subr.bf16.mxu1 %v2526_v17  ;;  %v2563_v48 = vld [vmem:[%s3619_s1 + $0x148] ss:$16 sps:$4 sm:$0xff]   ;;  %v2564_v49 = vld [vmem:[%s3619_s1 + $0x124] ss:$16 sps:$4 sm:$0xff]   ;;  %v2566_v50 = vld [vmem:[%s3619_s1 + $0x12c] ss:$16 sps:$4 sm:$0xff]  }
  0x24   : > { %2276 = vmatprep.mubr.msk.bf16.mxu0 %vm725_vm1, %v2578_v42  ;;  %2293 = vmatprep.mubr.msk.bf16.mxu1 %vm725_vm1, %v2578_v42  ;;  %v2568_v51 = vld [vmem:[%s3619_s1 + $0x120] ss:$16 sps:$4 sm:$0xff]   ;;  %v2569_v52 = vld [vmem:[%s3619_s1 + $0x128] ss:$16 sps:$4 sm:$0xff]   ;;  %v2570_v53 = vld [vmem:[%s3619_s1 + $0x104] ss:$16 sps:$4 sm:$0xff]  }
  0x25   : > { %v2572_v54 = vld [vmem:[%s3619_s1 + $0x10c] ss:$16 sps:$4 sm:$0xff]   ;;  %v2574_v55 = vld [vmem:[%s3619_s1 + $0x100] ss:$16 sps:$4 sm:$0xff]   ;;  %v2575_v56 = vld [vmem:[%s3619_s1 + $0x108] ss:$16 sps:$4 sm:$0xff]  }
  0x26   : > { %796 = vmatpush1.bf16.msra.mxu0 %v2528_v18  ;;  %989 = vmatpush1.bf16.msra.mxu1 %v2529_v19  ;;  %v2576_v57 = vld [vmem:[%s2887_s4] ss:$8 sps:$4 sm:$0xff]   ;;  %v2579_v58 = vld [vmem:[%s2887_s4 + $0x14] ss:$8 sps:$4 sm:$0xff]   ;;  %v2581_v59 = vld [vmem:[%s2887_s4 + $0x10] ss:$8 sps:$4 sm:$0xff]  }
  0x27   : > { %797 = vmatprep.subr.bf16.mxu0 %v2530_v20  ;;  %990 = vmatprep.subr.bf16.mxu1 %v2532_v21  ;;  %v2582_v60 = vld [vmem:[%s2887_s4 + $0x24] ss:$8 sps:$4 sm:$0xff]   ;;  %v2584_v61 = vld [vmem:[%s2887_s4 + $0x20] ss:$8 sps:$4 sm:$0xff]   ;;  %v2585_v62 = vld [vmem:[%s2887_s4 + $0x34] ss:$8 sps:$4 sm:$0xff]  }
  0x28   : > { %v2587_v63 = vld [vmem:[%s2887_s4 + $0x30] ss:$8 sps:$4 sm:$0xff]   ;;  %v2588_v0 = vld [vmem:[%s2887_s4 + $0x44] ss:$8 sps:$4 sm:$0xff]   ;;  %v2590_v1 = vld [vmem:[%s2887_s4 + $0x40] ss:$8 sps:$4 sm:$0xff]  }
  0x29   : > { %v2591_v2 = vld [vmem:[%s2887_s4 + $0x54] ss:$8 sps:$4 sm:$0xff]   ;;  %v2593_v3 = vld [vmem:[%s2887_s4 + $0x50] ss:$8 sps:$4 sm:$0xff]   ;;  %v2594_v4 = vld [vmem:[%s2887_s4 + $0x64] ss:$8 sps:$4 sm:$0xff]  }
  0x2a   : > { %798 = vmatpush1.bf16.msra.mxu0 %v2534_v22  ;;  %991 = vmatpush1.bf16.msra.mxu1 %v2535_v23  ;;  %v2596_v5 = vld [vmem:[%s2887_s4 + $0x60] ss:$8 sps:$4 sm:$0xff]   ;;  %v2597_v6 = vld [vmem:[%s2887_s4 + $0x74] ss:$8 sps:$4 sm:$0xff]   ;;  %v2599_v7 = vld [vmem:[%s2887_s4 + $0x70] ss:$8 sps:$4 sm:$0xff]  }
  0x2b   : > { %799 = vmatprep.subr.bf16.mxu0 %v2536_v24  ;;  %992 = vmatprep.subr.bf16.mxu1 %v2538_v25  ;;  %v2600_v8 = vld [vmem:[%s2887_s4 + $0x84] ss:$8 sps:$4 sm:$0xff]   ;;  %v2602_v9 = vld [vmem:[%s2887_s4 + $0x80] ss:$8 sps:$4 sm:$0xff]   ;;  %v2603_v10 = vld [vmem:[%s2887_s4 + $0x94] ss:$8 sps:$4 sm:$0xff]   ;;  %v295_v24 = vlaneseq }
  0x2c   : > { %v2605_v11 = vld [vmem:[%s2887_s4 + $0x90] ss:$8 sps:$4 sm:$0xff]   ;;  %v2606_v12 = vld [vmem:[%s2887_s4 + $0xa4] ss:$8 sps:$4 sm:$0xff]   ;;  %v2608_v13 = vld [vmem:[%s2887_s4 + $0xa0] ss:$8 sps:$4 sm:$0xff]  }
  0x2d   : > { %v2609_v14 = vld [vmem:[%s2887_s4 + $0xb4] ss:$8 sps:$4 sm:$0xff]   ;;  %v2611_v15 = vld [vmem:[%s2887_s4 + $0xb0] ss:$8 sps:$4 sm:$0xff]   ;;  %v2612_v16 = vld [vmem:[%s2887_s4 + $0xc4] ss:$8 sps:$4 sm:$0xff]  }
  0x2e   : > { %800 = vmatpush1.bf16.msra.mxu0 %v2540_v26  ;;  %993 = vmatpush1.bf16.msra.mxu1 %v2541_v27  ;;  %v2614_v17 = vld [vmem:[%s2887_s4 + $0xc0] ss:$8 sps:$4 sm:$0xff]   ;;  %v2615_v18 = vld [vmem:[%s2887_s4 + $0xd4] ss:$8 sps:$4 sm:$0xff]   ;;  %v2617_v19 = vld [vmem:[%s2887_s4 + $0xd0] ss:$8 sps:$4 sm:$0xff]  }
  0x2f   : > { %801 = vmatprep.subr.bf16.mxu0 %v2542_v28  ;;  %994 = vmatprep.subr.bf16.mxu1 %v2544_v29  ;;  %v2618_v20 = vld [vmem:[%s2887_s4 + $0xe4] ss:$8 sps:$4 sm:$0xff]   ;;  %v2620_v21 = vld [vmem:[%s2887_s4 + $0xe0] ss:$8 sps:$4 sm:$0xff]   ;;  %v2621_v22 = vld [vmem:[%s2887_s4 + $0xf4] ss:$8 sps:$4 sm:$0xff]  }
  0x30   : > { %v2623_v23 = vld [vmem:[%s2887_s4 + $0xf0] ss:$8 sps:$4 sm:$0xff]   ;;  %v296_v25 = vshrl.u32 %v295_v24, 7  ;;  %v209_v27 = vld [vmem:[%s3620_s2] sm:$0x77]  ;;  %s188_s4 = sand.u32 1, %s2684_s13  }
  0x31   : > { %v210_v28 = vld [vmem:[%s3620_s2 + $0x8] sm:$0x77]  ;;  %s2188_s8 = sshll.u32 %s188_s4, 9  ;;  %s3573_s21 = scalar_lea.sflag [#allocation3], %s188_s4 }
  0x32   : > { %802 = vmatpush1.bf16.msra.mxu0 %v2546_v32  ;;  %995 = vmatpush1.bf16.msra.mxu1 %v2547_v33  ;;  %v297_v26 = vsub.s32 0, %v296_v25  ;;  %v301_v29 = vsub.s32 4, %v296_v25  ;;  %v1303_v31 = vsub.s32 1, %v296_v25  ;;  %v1467_v33 = vsub.s32 2, %v296_v25  ;;  %s3058_s9 = scalar_lea.vmem [#allocation2], %s2188_s8 }
  0x33   : > { %2275 = vmatprep.subr.msk.bf16.mxu0 %vm774_vm0, %v2272_v34  ;;  %2292 = vmatprep.subr.msk.bf16.mxu1 %vm774_vm0, %v2274_v35  ;;  %v1307_v34 = vsub.s32 5, %v296_v25  ;;  %v1471_v37 = vsub.s32 6, %v296_v25  ;;  %s2101_s11 = sshll.u32 %s3058_s9, 4  ;;  %s3567_s11 = int_to_ptr.vmem [resolvable:$true] %s2101_s11 }
  0x34   : > { %v298_v30 = vrot.slane %v209_v27, %v297_v26  ;;  %v306_v32 = vrot.slane %v210_v28, %v297_v26  ;;  %v302_v35 = vrot.slane %v209_v27, %v301_v29  ;;  %v310_v36 = vrot.slane %v210_v28, %v301_v29  ;;  %s2624_s23 = scalar_lea.vmem %s3567_s11, 8192  ;;  %p2631_p1 = scmp.lt.s32.totalorder %s3567_s11, %s2629_s27 }
  0x35   : > { %v1468_v42 = vrot.slane %v209_v27, %v1467_v33  ;;  %p2625_p12 = scmp.ne.s32.totalorder %s3567_s11, %s2624_s23  ;;  %p2632_p2 = scmp.lt.s32.totalorder %s2630_s28, %s2624_s23 }
  0x36   : > { %810 = vmatpush2.bf16.msra.mxu0 %v776_v39  ;;  %1003 = vmatpush2.bf16.msra.mxu1 %v782_v40  ;;  %v1304_v39 = vrot.slane %v209_v27, %v1303_v31  ;;  %v3009_v40 = vrot.slane %v306_v32, %v297_v26 }
  0x37   : > { %811 = vmatprep.subr.bf16.mxu0 %v2552_v38  ;;  %1004 = vmatprep.subr.bf16.mxu1 %v2554_v41  ;;  %v3007_v38 = vrot.slane %v298_v30, %v297_v26  ;;  %v1312_v41 = vrot.slane %v210_v28, %v1303_v31  ;;  %p2626_p13 = pnand %p2625_p12, %p2765_p4  ;;  %p2633_p3 = por %p2632_p2, %p2631_p1 }
  0x39   : > { %p2627_p0 = pneg %p2626_p13 }
  0x3a   : > { %812 = vmatpush2.bf16.msra.mxu0 %v2556_v43  ;;  %1005 = vmatpush2.bf16.msra.mxu1 %v2557_v44  ;;  %v1476_v43 = vrot.slane %v210_v28, %v1467_v33  ;;  %v1308_v44 = vrot.slane %v209_v27, %v1307_v34 }
  0x3b   : > { %813 = vmatprep.subr.bf16.mxu0 %v2558_v45  ;;  %1006 = vmatprep.subr.bf16.mxu1 %v2560_v46  ;;  %v1316_v45 = vrot.slane %v210_v28, %v1307_v34  ;;  %v3011_v46 = vrot.slane %v302_v35, %v297_v26  ;;  %p2634_p5 = pnand %p2633_p3, %p2627_p0 }
  0x3e   : > { %814 = vmatpush2.bf16.msra.mxu0 %v2562_v47  ;;  %1007 = vmatpush2.bf16.msra.mxu1 %v2563_v48  ;;  %v3013_v47 = vrot.slane %v310_v36, %v297_v26 }
  0x3f   : > { %815 = vmatprep.subr.bf16.mxu0 %v2564_v49  ;;  %1008 = vmatprep.subr.bf16.mxu1 %v2566_v50  ;;  %v1472_v50 = vrot.slane %v209_v27, %v1471_v37 }
  0x42   : > { %816 = vmatpush2.bf16.msra.mxu0 %v2568_v51  ;;  %1009 = vmatpush2.bf16.msra.mxu1 %v2569_v52  ;;  %v1480_v51 = vrot.slane %v210_v28, %v1471_v37 }
  0x43   : > { %817 = vmatprep.subr.bf16.mxu0 %v2570_v53  ;;  %1010 = vmatprep.subr.bf16.mxu1 %v2572_v54  ;;  %v3016_v53 = vrot.slane %v1304_v39, %v1303_v31 }
  0x46   : > { %818 = vmatpush2.bf16.msra.mxu0 %v2574_v55  ;;  %1011 = vmatpush2.bf16.msra.mxu1 %v2575_v56  ;;  %v3019_v55 = vrot.slane %v1312_v41, %v1303_v31  ;;  %v3021_v56 = vrot.slane %v1468_v42, %v1467_v33 }
  0x49   : > { %820 = vmatmul.mubr.bf16.vlgmr.msra.gmra.mxu0 %v2576_v57  ;;  %1013 = vmatmul.mubr.bf16.vlgmr.msra.gmra.mxu1 %v2576_v57  ;;  %v3023_v57 = vrot.slane %v1476_v43, %v1467_v33 }
  0x4a   : > { %2277 = vmatprep.mubr.msk.bf16.mxu0 %vm725_vm1, %v2579_v58  ;;  %2294 = vmatprep.mubr.msk.bf16.mxu1 %vm725_vm1, %v2579_v58 }
  0x51   : > { %830 = vmatmul.mubr.bf16.gmra.mxu0 %v2581_v59  ;;  %1023 = vmatmul.mubr.bf16.gmra.mxu1 %v2581_v59  ;;  %v3025_v59 = vrot.slane %v1308_v44, %v1303_v31 }
  0x52   : > { %2278 = vmatprep.mubr.msk.bf16.mxu0 %vm725_vm1, %v2582_v60  ;;  %2295 = vmatprep.mubr.msk.bf16.mxu1 %vm725_vm1, %v2582_v60 }
  0x59   : > { %840 = vmatmul.mubr.bf16.gmra.mxu0 %v2584_v61  ;;  %1033 = vmatmul.mubr.bf16.gmra.mxu1 %v2584_v61  ;;  %v3027_v61 = vrot.slane %v1316_v45, %v1303_v31 }
  0x5a   : > { %2279 = vmatprep.mubr.msk.bf16.mxu0 %vm725_vm1, %v2585_v62  ;;  %2296 = vmatprep.mubr.msk.bf16.mxu1 %vm725_vm1, %v2585_v62 }
  0x61   : > { %850 = vmatmul.mubr.bf16.gmra.mxu0 %v2587_v63  ;;  %1043 = vmatmul.mubr.bf16.gmra.mxu1 %v2587_v63 }
  0x62   : > { %2280 = vmatprep.mubr.msk.bf16.mxu0 %vm725_vm1, %v2588_v0  ;;  %2297 = vmatprep.mubr.msk.bf16.mxu1 %vm725_vm1, %v2588_v0 }
  0x69   : > { %860 = vmatmul.mubr.bf16.gmra.mxu0 %v2590_v1  ;;  %1053 = vmatmul.mubr.bf16.gmra.mxu1 %v2590_v1 }
  0x6a   : > { %2281 = vmatprep.mubr.msk.bf16.mxu0 %vm725_vm1, %v2591_v2  ;;  %2298 = vmatprep.mubr.msk.bf16.mxu1 %vm725_vm1, %v2591_v2  ;;  %v3032_v2 = vrot.slane %v1472_v50, %v1467_v33 }
  0x71   : > { %870 = vmatmul.mubr.bf16.gmra.mxu0 %v2593_v3  ;;  %1063 = vmatmul.mubr.bf16.gmra.mxu1 %v2593_v3  ;;  %v3034_v3 = vrot.slane %v1480_v51, %v1467_v33 }
  0x72   : > { %2282 = vmatprep.mubr.msk.bf16.mxu0 %vm725_vm1, %v2594_v4  ;;  %2299 = vmatprep.mubr.msk.bf16.mxu1 %vm725_vm1, %v2594_v4 }
  0x79   : > { %880 = vmatmul.mubr.bf16.gmra.mxu0 %v2596_v5  ;;  %1073 = vmatmul.mubr.bf16.gmra.mxu1 %v2596_v5 }
  0x7a   : > { %2283 = vmatprep.mubr.msk.bf16.mxu0 %vm725_vm1, %v2597_v6  ;;  %2300 = vmatprep.mubr.msk.bf16.mxu1 %vm725_vm1, %v2597_v6 }
  0x81   : > { %890 = vmatmul.mubr.bf16.gmra.mxu0 %v2599_v7  ;;  %1083 = vmatmul.mubr.bf16.gmra.mxu1 %v2599_v7 }
  0x82   : > { %2284 = vmatprep.mubr.msk.bf16.mxu0 %vm725_vm1, %v2600_v8  ;;  %2301 = vmatprep.mubr.msk.bf16.mxu1 %vm725_vm1, %v2600_v8 }
  0x89   : > { %900 = vmatmul.mubr.bf16.gmra.mxu0 %v2602_v9  ;;  %1093 = vmatmul.mubr.bf16.gmra.mxu1 %v2602_v9 }
  0x8a   : > { %2285 = vmatprep.mubr.msk.bf16.mxu0 %vm725_vm1, %v2603_v10  ;;  %2302 = vmatprep.mubr.msk.bf16.mxu1 %vm725_vm1, %v2603_v10 }
  0x91   : > { %910 = vmatmul.mubr.bf16.gmra.mxu0 %v2605_v11  ;;  %1103 = vmatmul.mubr.bf16.gmra.mxu1 %v2605_v11 }
  0x92   : > { %2286 = vmatprep.mubr.msk.bf16.mxu0 %vm725_vm1, %v2606_v12  ;;  %2303 = vmatprep.mubr.msk.bf16.mxu1 %vm725_vm1, %v2606_v12 }
  0x99   : > { %920 = vmatmul.mubr.bf16.gmra.mxu0 %v2608_v13  ;;  %1113 = vmatmul.mubr.bf16.gmra.mxu1 %v2608_v13 }
  0x9a   : > { %2287 = vmatprep.mubr.msk.bf16.mxu0 %vm725_vm1, %v2609_v14  ;;  %2304 = vmatprep.mubr.msk.bf16.mxu1 %vm725_vm1, %v2609_v14 }
  0xa1   : > { %930 = vmatmul.mubr.bf16.gmra.mxu0 %v2611_v15  ;;  %1123 = vmatmul.mubr.bf16.gmra.mxu1 %v2611_v15 }
  0xa2   : > { %2288 = vmatprep.mubr.msk.bf16.mxu0 %vm725_vm1, %v2612_v16  ;;  %2305 = vmatprep.mubr.msk.bf16.mxu1 %vm725_vm1, %v2612_v16 }
  0xa9   : > { %940 = vmatmul.mubr.bf16.gmra.mxu0 %v2614_v17  ;;  %1133 = vmatmul.mubr.bf16.gmra.mxu1 %v2614_v17 }
  0xaa   : > { %2289 = vmatprep.mubr.msk.bf16.mxu0 %vm725_vm1, %v2615_v18  ;;  %2306 = vmatprep.mubr.msk.bf16.mxu1 %vm725_vm1, %v2615_v18 }
  0xb1   : > { %950 = vmatmul.mubr.bf16.gmra.mxu0 %v2617_v19  ;;  %1143 = vmatmul.mubr.bf16.gmra.mxu1 %v2617_v19 }
  0xb2   : > { %2290 = vmatprep.mubr.msk.bf16.mxu0 %vm725_vm1, %v2618_v20  ;;  %2307 = vmatprep.mubr.msk.bf16.mxu1 %vm725_vm1, %v2618_v20 }
  0xb9   : > { %960 = vmatmul.mubr.bf16.gmra.mxu0 %v2620_v21  ;;  %1153 = vmatmul.mubr.bf16.gmra.mxu1 %v2620_v21 }
  0xba   : > { %2291 = vmatprep.mubr.msk.bf16.mxu0 %vm725_vm1, %v2621_v22  ;;  %2308 = vmatprep.mubr.msk.bf16.mxu1 %vm725_vm1, %v2621_v22 }
  0xc1   : > { %970 = vmatmul.mubr.bf16.gmra.mxu0 %v2623_v23  ;;  %1163 = vmatmul.mubr.bf16.gmra.mxu1 %v2623_v23 }
 0x109   : > { %v821_v48 = vpop.f32.mrf.mxu0  ;;  %v1014_v49 = vpop.f32.mrf.mxu1 }
 0x10a   : > { %v822_v52 = vadd.f32 %v821_v48, %v3007_v38  ;;  %v1015_v54 = vadd.f32 %v1014_v49, %v3009_v40 }
 0x10b   : > { %v823_v58 = vpop.f32.mrf.mxu0  ;;  %v1016_v60 = vpop.f32.mrf.mxu1 }
 0x10c   : > { %v1173_v62 = vmax.f32 %v822_v52, 0.0  ;;  %v1175_v63 = vmax.f32 %v1015_v54, 0.0  ;;  %v824_v0 = vadd.f32 %v823_v58, %v3011_v46  ;;  %v1017_v1 = vadd.f32 %v1016_v60, %v3013_v47 }
 0x10d   : > { %v825_v4 = vpop.f32.mrf.mxu0  ;;  %v1018_v5 = vpop.f32.mrf.mxu1 }
 0x10e   : > { %v1337_v6 = vmul.f32 %v3016_v53, %v1173_v62  ;;  %v1339_v7 = vmul.f32 %v3019_v55, %v1175_v63  ;;  %v1174_v8 = vmax.f32 %v824_v0, 0.0  ;;  %v1176_v9 = vmax.f32 %v1017_v1, 0.0 }
 0x10f   : > { %v826_v10 = vadd.f32 %v825_v4, %v3007_v38  ;;  %v1019_v11 = vadd.f32 %v1018_v5, %v3009_v40  ;;  %v827_v12 = vpop.f32.mrf.mxu0  ;;  %v1020_v13 = vpop.f32.mrf.mxu1 }
 0x110   : > { %v1501_v14 = vadd.f32 %v3021_v56, %v1337_v6  ;;  %v1503_v15 = vadd.f32 %v3023_v57, %v1339_v7  ;;  %v1338_v16 = vmul.f32 %v3025_v59, %v1174_v8  ;;  %v1340_v17 = vmul.f32 %v3027_v61, %v1176_v9 }
 0x111   : > { %v1177_v18 = vmax.f32 %v826_v10, 0.0  ;;  %v1179_v19 = vmax.f32 %v1019_v11, 0.0  ;;  %v828_v20 = vadd.f32 %v827_v12, %v3011_v46  ;;  %v1021_v21 = vadd.f32 %v1020_v13, %v3013_v47  ;;  %v831_v22 = vpop.f32.mrf.mxu0  ;;  %v1024_v23 = vpop.f32.mrf.mxu1 }
 0x112   : > { %v1502_v24 = vadd.f32 %v3032_v2, %v1338_v16  ;;  %v1504_v25 = vadd.f32 %v3034_v3, %v1340_v17  ;;  %v832_v26 = vadd.f32 %v831_v22, %v3007_v38  ;;  %v1025_v27 = vadd.f32 %v1024_v23, %v3009_v40 }
 0x113   : > { %v1341_v28 = vmul.f32 %v3016_v53, %v1177_v18  ;;  %v1343_v29 = vmul.f32 %v3019_v55, %v1179_v19  ;;  %v1178_v30 = vmax.f32 %v828_v20, 0.0  ;;  %v1180_v31 = vmax.f32 %v1021_v21, 0.0  ;;  %v833_v32 = vpop.f32.mrf.mxu0  ;;  %v1026_v33 = vpop.f32.mrf.mxu1 }
 0x114   : > { %v2378_v34 = vpack.c.bf16 %v1502_v24, %v1501_v14  ;;  %v2379_v35 = vpack.c.bf16 %v1504_v25, %v1503_v15  ;;  %v1181_v36 = vmax.f32 %v832_v26, 0.0  ;;  %v1183_v37 = vmax.f32 %v1025_v27, 0.0 }
 0x115   : > { %v1505_v39 = vadd.f32 %v3021_v56, %v1341_v28  ;;  %v1507_v41 = vadd.f32 %v3023_v57, %v1343_v29  ;;  %v1342_v42 = vmul.f32 %v3025_v59, %v1178_v30  ;;  %v1344_v43 = vmul.f32 %v3027_v61, %v1180_v31  ;;  %v835_v44 = vpop.f32.mrf.mxu0  ;;  %v1028_v45 = vpop.f32.mrf.mxu1 }
 0x116   : > { %2013 = vst [vmem:[%s3058_s9] sm:$0xff] %v2378_v34  ;;  %2014 = vst [vmem:[%s3058_s9 + $0x8] sm:$0xff] %v2379_v35  ;;  %v1345_v48 = vmul.f32 %v3016_v53, %v1181_v36  ;;  %v1347_v49 = vmul.f32 %v3019_v55, %v1183_v37  ;;  %v834_v50 = vadd.f32 %v833_v32, %v3011_v46 }
 0x117   : > { %v1027_v51 = vadd.f32 %v1026_v33, %v3013_v47  ;;  %v1506_v52 = vadd.f32 %v3032_v2, %v1342_v42  ;;  %v1508_v54 = vadd.f32 %v3034_v3, %v1344_v43  ;;  %v836_v58 = vadd.f32 %v835_v44, %v3007_v38  ;;  %v837_v62 = vpop.f32.mrf.mxu0  ;;  %v1030_v63 = vpop.f32.mrf.mxu1 }
 0x118   : > { %v1029_v60 = vadd.f32 %v1028_v45, %v3009_v40  ;;  %v1509_v0 = vadd.f32 %v3021_v56, %v1345_v48  ;;  %v1511_v1 = vadd.f32 %v3023_v57, %v1347_v49  ;;  %v1182_v4 = vmax.f32 %v834_v50, 0.0 }
 0x119   : > { %v1184_v5 = vmax.f32 %v1027_v51, 0.0  ;;  %v2380_v6 = vpack.c.bf16 %v1506_v52, %v1505_v39  ;;  %v2381_v7 = vpack.c.bf16 %v1508_v54, %v1507_v41  ;;  %v1185_v8 = vmax.f32 %v836_v58, 0.0  ;;  %v841_v10 = vpop.f32.mrf.mxu0  ;;  %v1034_v11 = vpop.f32.mrf.mxu1 }
 0x11a   : > { %v1187_v9 = vmax.f32 %v1029_v60, 0.0  ;;  %v1346_v12 = vmul.f32 %v3025_v59, %v1182_v4  ;;  %v838_v14 = vadd.f32 %v837_v62, %v3011_v46  ;;  %v1031_v15 = vadd.f32 %v1030_v63, %v3013_v47 }
 0x11b   : > { %v1348_v13 = vmul.f32 %v3027_v61, %v1184_v5  ;;  %2015 = vst [vmem:[%s3058_s9 + $0x10] sm:$0xff] %v2380_v6  ;;  %2016 = vst [vmem:[%s3058_s9 + $0x18] sm:$0xff] %v2381_v7  ;;  %v1349_v16 = vmul.f32 %v3016_v53, %v1185_v8  ;;  %v842_v18 = vadd.f32 %v841_v10, %v3007_v38  ;;  %v843_v20 = vpop.f32.mrf.mxu0  ;;  %v1036_v21 = vpop.f32.mrf.mxu1 }
 0x11c   : > { %v1351_v17 = vmul.f32 %v3019_v55, %v1187_v9  ;;  %v1035_v19 = vadd.f32 %v1034_v11, %v3009_v40  ;;  %v1510_v22 = vadd.f32 %v3032_v2, %v1346_v12  ;;  %v1186_v24 = vmax.f32 %v838_v14, 0.0 }
 0x11d   : > { %v1512_v23 = vadd.f32 %v3034_v3, %v1348_v13  ;;  %v1188_v25 = vmax.f32 %v1031_v15, 0.0  ;;  %v1513_v26 = vadd.f32 %v3021_v56, %v1349_v16  ;;  %v1189_v28 = vmax.f32 %v842_v18, 0.0  ;;  %v845_v30 = vpop.f32.mrf.mxu0  ;;  %v1038_v31 = vpop.f32.mrf.mxu1 }
 0x11e   : > { %v1515_v27 = vadd.f32 %v3023_v57, %v1351_v17  ;;  %v1191_v29 = vmax.f32 %v1035_v19, 0.0  ;;  %v2382_v32 = vpack.c.bf16 %v1510_v22, %v1509_v0  ;;  %v1350_v34 = vmul.f32 %v3025_v59, %v1186_v24 }
 0x11f   : > { %v2383_v33 = vpack.c.bf16 %v1512_v23, %v1511_v1  ;;  %v1352_v35 = vmul.f32 %v3027_v61, %v1188_v25  ;;  %v1353_v36 = vmul.f32 %v3016_v53, %v1189_v28  ;;  %v844_v39 = vadd.f32 %v843_v20, %v3011_v46  ;;  %v847_v42 = vpop.f32.mrf.mxu0  ;;  %v1040_v43 = vpop.f32.mrf.mxu1 }
 0x120   : > { %v1355_v37 = vmul.f32 %v3019_v55, %v1191_v29  ;;  %v1037_v41 = vadd.f32 %v1036_v21, %v3013_v47  ;;  %2017 = vst [vmem:[%s3058_s9 + $0x20] sm:$0xff] %v2382_v32  ;;  %v1514_v44 = vadd.f32 %v3032_v2, %v1350_v34  ;;  %v846_v48 = vadd.f32 %v845_v30, %v3007_v38 }
 0x121   : > { %2018 = vst [vmem:[%s3058_s9 + $0x28] sm:$0xff] %v2383_v33  ;;  %v1516_v45 = vadd.f32 %v3034_v3, %v1352_v35  ;;  %v1039_v49 = vadd.f32 %v1038_v31, %v3009_v40  ;;  %v1517_v50 = vadd.f32 %v3021_v56, %v1353_v36  ;;  %v1190_v52 = vmax.f32 %v844_v39, 0.0  ;;  %v851_v58 = vpop.f32.mrf.mxu0  ;;  %v1044_v60 = vpop.f32.mrf.mxu1 }
 0x122   : > { %v1519_v51 = vadd.f32 %v3023_v57, %v1355_v37  ;;  %v1192_v54 = vmax.f32 %v1037_v41, 0.0  ;;  %v2384_v62 = vpack.c.bf16 %v1514_v44, %v1513_v26  ;;  %v1193_v0 = vmax.f32 %v846_v48, 0.0 }
 0x123   : > { %v2385_v63 = vpack.c.bf16 %v1516_v45, %v1515_v27  ;;  %v1195_v1 = vmax.f32 %v1039_v49, 0.0  ;;  %v1354_v4 = vmul.f32 %v3025_v59, %v1190_v52  ;;  %v848_v6 = vadd.f32 %v847_v42, %v3011_v46  ;;  %v853_v8 = vpop.f32.mrf.mxu0  ;;  %v1046_v9 = vpop.f32.mrf.mxu1 }
 0x124   : > { %v1356_v5 = vmul.f32 %v3027_v61, %v1192_v54  ;;  %v1041_v7 = vadd.f32 %v1040_v43, %v3013_v47  ;;  %2019 = vst [vmem:[%s3058_s9 + $0x30] sm:$0xff] %v2384_v62  ;;  %v1357_v10 = vmul.f32 %v3016_v53, %v1193_v0  ;;  %v852_v12 = vadd.f32 %v851_v58, %v3007_v38 }
 0x125   : > { %2020 = vst [vmem:[%s3058_s9 + $0x38] sm:$0xff] %v2385_v63  ;;  %v1359_v11 = vmul.f32 %v3019_v55, %v1195_v1  ;;  %v1045_v13 = vadd.f32 %v1044_v60, %v3009_v40  ;;  %v1518_v14 = vadd.f32 %v3032_v2, %v1354_v4  ;;  %v1194_v16 = vmax.f32 %v848_v6, 0.0  ;;  %v855_v18 = vpop.f32.mrf.mxu0  ;;  %v1048_v19 = vpop.f32.mrf.mxu1 }
 0x126   : > { %v1520_v15 = vadd.f32 %v3034_v3, %v1356_v5  ;;  %v1196_v17 = vmax.f32 %v1041_v7, 0.0  ;;  %v1521_v20 = vadd.f32 %v3021_v56, %v1357_v10  ;;  %v1197_v22 = vmax.f32 %v852_v12, 0.0 }
 0x127   : > { %v1523_v21 = vadd.f32 %v3023_v57, %v1359_v11  ;;  %v1199_v23 = vmax.f32 %v1045_v13, 0.0  ;;  %v2386_v24 = vpack.c.bf16 %v1518_v14, %v1517_v50  ;;  %v1358_v26 = vmul.f32 %v3025_v59, %v1194_v16  ;;  %v857_v28 = vpop.f32.mrf.mxu0  ;;  %v1050_v29 = vpop.f32.mrf.mxu1 }
 0x128   : > { %v2387_v25 = vpack.c.bf16 %v1520_v15, %v1519_v51  ;;  %v1360_v27 = vmul.f32 %v3027_v61, %v1196_v17  ;;  %v1361_v30 = vmul.f32 %v3016_v53, %v1197_v22  ;;  %v854_v32 = vadd.f32 %v853_v8, %v3011_v46 }
 0x129   : > { %v1363_v31 = vmul.f32 %v3019_v55, %v1199_v23  ;;  %v1047_v33 = vadd.f32 %v1046_v9, %v3013_v47  ;;  %2021 = vst [vmem:[%s3058_s9 + $0x40] sm:$0xff] %v2386_v24  ;;  %v1522_v34 = vadd.f32 %v3032_v2, %v1358_v26  ;;  %v856_v36 = vadd.f32 %v855_v18, %v3007_v38  ;;  %v861_v39 = vpop.f32.mrf.mxu0  ;;  %v1054_v41 = vpop.f32.mrf.mxu1 }
 0x12a   : > { %2022 = vst [vmem:[%s3058_s9 + $0x48] sm:$0xff] %v2387_v25  ;;  %v1524_v35 = vadd.f32 %v3034_v3, %v1360_v27  ;;  %v1049_v37 = vadd.f32 %v1048_v19, %v3009_v40  ;;  %v1525_v42 = vadd.f32 %v3021_v56, %v1361_v30  ;;  %v1198_v44 = vmax.f32 %v854_v32, 0.0 }
 0x12b   : > { %v1527_v43 = vadd.f32 %v3023_v57, %v1363_v31  ;;  %v1200_v45 = vmax.f32 %v1047_v33, 0.0  ;;  %v2388_v48 = vpack.c.bf16 %v1522_v34, %v1521_v20  ;;  %v1201_v50 = vmax.f32 %v856_v36, 0.0  ;;  %v863_v52 = vpop.f32.mrf.mxu0  ;;  %v1056_v54 = vpop.f32.mrf.mxu1 }
 0x12c   : > { %v2389_v49 = vpack.c.bf16 %v1524_v35, %v1523_v21  ;;  %v1203_v51 = vmax.f32 %v1049_v37, 0.0  ;;  %v1362_v58 = vmul.f32 %v3025_v59, %v1198_v44  ;;  %v858_v62 = vadd.f32 %v857_v28, %v3011_v46 }
 0x12d   : > { %v1364_v60 = vmul.f32 %v3027_v61, %v1200_v45  ;;  %v1051_v63 = vadd.f32 %v1050_v29, %v3013_v47  ;;  %2023 = vst [vmem:[%s3058_s9 + $0x50] sm:$0xff] %v2388_v48  ;;  %v1365_v0 = vmul.f32 %v3016_v53, %v1201_v50  ;;  %v862_v4 = vadd.f32 %v861_v39, %v3007_v38  ;;  %v865_v6 = vpop.f32.mrf.mxu0  ;;  %v1058_v7 = vpop.f32.mrf.mxu1 }
 0x12e   : > { %2024 = vst [vmem:[%s3058_s9 + $0x58] sm:$0xff] %v2389_v49  ;;  %v1367_v1 = vmul.f32 %v3019_v55, %v1203_v51  ;;  %v1055_v5 = vadd.f32 %v1054_v41, %v3009_v40  ;;  %v1526_v8 = vadd.f32 %v3032_v2, %v1362_v58  ;;  %v1202_v10 = vmax.f32 %v858_v62, 0.0 }
 0x12f   : > { %v1528_v9 = vadd.f32 %v3034_v3, %v1364_v60  ;;  %v1204_v11 = vmax.f32 %v1051_v63, 0.0  ;;  %v1529_v12 = vadd.f32 %v3021_v56, %v1365_v0  ;;  %v1205_v14 = vmax.f32 %v862_v4, 0.0  ;;  %v867_v16 = vpop.f32.mrf.mxu0  ;;  %v1060_v17 = vpop.f32.mrf.mxu1 }
 0x130   : > { %v1531_v13 = vadd.f32 %v3023_v57, %v1367_v1  ;;  %v1207_v15 = vmax.f32 %v1055_v5, 0.0  ;;  %v2390_v18 = vpack.c.bf16 %v1526_v8, %v1525_v42  ;;  %v1366_v20 = vmul.f32 %v3025_v59, %v1202_v10 }
 0x131   : > { %v2391_v19 = vpack.c.bf16 %v1528_v9, %v1527_v43  ;;  %v1368_v21 = vmul.f32 %v3027_v61, %v1204_v11  ;;  %v1369_v22 = vmul.f32 %v3016_v53, %v1205_v14  ;;  %v864_v24 = vadd.f32 %v863_v52, %v3011_v46  ;;  %v871_v26 = vpop.f32.mrf.mxu0  ;;  %v1064_v27 = vpop.f32.mrf.mxu1 }
 0x132   : > { %v1371_v23 = vmul.f32 %v3019_v55, %v1207_v15  ;;  %v1057_v25 = vadd.f32 %v1056_v54, %v3013_v47  ;;  %2025 = vst [vmem:[%s3058_s9 + $0x60] sm:$0xff] %v2390_v18  ;;  %v1530_v28 = vadd.f32 %v3032_v2, %v1366_v20  ;;  %v866_v30 = vadd.f32 %v865_v6, %v3007_v38 }
 0x133   : > { %2026 = vst [vmem:[%s3058_s9 + $0x68] sm:$0xff] %v2391_v19  ;;  %v1532_v29 = vadd.f32 %v3034_v3, %v1368_v21  ;;  %v1059_v31 = vadd.f32 %v1058_v7, %v3009_v40  ;;  %v1533_v32 = vadd.f32 %v3021_v56, %v1369_v22  ;;  %v1206_v34 = vmax.f32 %v864_v24, 0.0  ;;  %v873_v36 = vpop.f32.mrf.mxu0  ;;  %v1066_v37 = vpop.f32.mrf.mxu1 }
 0x134   : > { %v1535_v33 = vadd.f32 %v3023_v57, %v1371_v23  ;;  %v1208_v35 = vmax.f32 %v1057_v25, 0.0  ;;  %v2392_v39 = vpack.c.bf16 %v1530_v28, %v1529_v12  ;;  %v1209_v42 = vmax.f32 %v866_v30, 0.0 }
 0x135   : > { %v2393_v41 = vpack.c.bf16 %v1532_v29, %v1531_v13  ;;  %v1211_v43 = vmax.f32 %v1059_v31, 0.0  ;;  %v1370_v44 = vmul.f32 %v3025_v59, %v1206_v34  ;;  %v868_v48 = vadd.f32 %v867_v16, %v3011_v46  ;;  %v875_v50 = vpop.f32.mrf.mxu0  ;;  %v1068_v51 = vpop.f32.mrf.mxu1 }
 0x136   : > { %v1372_v45 = vmul.f32 %v3027_v61, %v1208_v35  ;;  %v1061_v49 = vadd.f32 %v1060_v17, %v3013_v47  ;;  %2027 = vst [vmem:[%s3058_s9 + $0x70] sm:$0xff] %v2392_v39  ;;  %v1373_v52 = vmul.f32 %v3016_v53, %v1209_v42  ;;  %v872_v58 = vadd.f32 %v871_v26, %v3007_v38 }
 0x137   : > { %2028 = vst [vmem:[%s3058_s9 + $0x78] sm:$0xff] %v2393_v41  ;;  %v1375_v54 = vmul.f32 %v3019_v55, %v1211_v43  ;;  %v1065_v60 = vadd.f32 %v1064_v27, %v3009_v40  ;;  %v1534_v62 = vadd.f32 %v3032_v2, %v1370_v44  ;;  %v1210_v0 = vmax.f32 %v868_v48, 0.0  ;;  %v877_v4 = vpop.f32.mrf.mxu0  ;;  %v1070_v5 = vpop.f32.mrf.mxu1 }
 0x138   : > { %v1536_v63 = vadd.f32 %v3034_v3, %v1372_v45  ;;  %v1212_v1 = vmax.f32 %v1061_v49, 0.0  ;;  %v1537_v6 = vadd.f32 %v3021_v56, %v1373_v52  ;;  %v1213_v8 = vmax.f32 %v872_v58, 0.0 }
 0x139   : > { %v1539_v7 = vadd.f32 %v3023_v57, %v1375_v54  ;;  %v1215_v9 = vmax.f32 %v1065_v60, 0.0  ;;  %v2394_v10 = vpack.c.bf16 %v1534_v62, %v1533_v32  ;;  %v1374_v12 = vmul.f32 %v3025_v59, %v1210_v0  ;;  %v881_v14 = vpop.f32.mrf.mxu0  ;;  %v1074_v15 = vpop.f32.mrf.mxu1 }
 0x13a   : > { %v2395_v11 = vpack.c.bf16 %v1536_v63, %v1535_v33  ;;  %v1376_v13 = vmul.f32 %v3027_v61, %v1212_v1  ;;  %v1377_v16 = vmul.f32 %v3016_v53, %v1213_v8  ;;  %v874_v18 = vadd.f32 %v873_v36, %v3011_v46 }
 0x13b   : > { %v1379_v17 = vmul.f32 %v3019_v55, %v1215_v9  ;;  %v1067_v19 = vadd.f32 %v1066_v37, %v3013_v47  ;;  %2029 = vst [vmem:[%s3058_s9 + $0x80] sm:$0xff] %v2394_v10  ;;  %v1538_v20 = vadd.f32 %v3032_v2, %v1374_v12  ;;  %v876_v22 = vadd.f32 %v875_v50, %v3007_v38  ;;  %v883_v24 = vpop.f32.mrf.mxu0  ;;  %v1076_v25 = vpop.f32.mrf.mxu1 }
 0x13c   : > { %2030 = vst [vmem:[%s3058_s9 + $0x88] sm:$0xff] %v2395_v11  ;;  %v1540_v21 = vadd.f32 %v3034_v3, %v1376_v13  ;;  %v1069_v23 = vadd.f32 %v1068_v51, %v3009_v40  ;;  %v1541_v26 = vadd.f32 %v3021_v56, %v1377_v16  ;;  %v1214_v28 = vmax.f32 %v874_v18, 0.0 }
 0x13d   : > { %v1543_v27 = vadd.f32 %v3023_v57, %v1379_v17  ;;  %v1216_v29 = vmax.f32 %v1067_v19, 0.0  ;;  %v2396_v30 = vpack.c.bf16 %v1538_v20, %v1537_v6  ;;  %v1217_v32 = vmax.f32 %v876_v22, 0.0  ;;  %v885_v34 = vpop.f32.mrf.mxu0  ;;  %v1078_v35 = vpop.f32.mrf.mxu1 }
 0x13e   : > { %v2397_v31 = vpack.c.bf16 %v1540_v21, %v1539_v7  ;;  %v1219_v33 = vmax.f32 %v1069_v23, 0.0  ;;  %v1378_v36 = vmul.f32 %v3025_v59, %v1214_v28  ;;  %v878_v39 = vadd.f32 %v877_v4, %v3011_v46 }
 0x13f   : > { %v1380_v37 = vmul.f32 %v3027_v61, %v1216_v29  ;;  %v1071_v41 = vadd.f32 %v1070_v5, %v3013_v47  ;;  %2031 = vst [vmem:[%s3058_s9 + $0x90] sm:$0xff] %v2396_v30  ;;  %v1381_v42 = vmul.f32 %v3016_v53, %v1217_v32  ;;  %v882_v44 = vadd.f32 %v881_v14, %v3007_v38  ;;  %v887_v48 = vpop.f32.mrf.mxu0  ;;  %v1080_v49 = vpop.f32.mrf.mxu1 }
 0x140   : > { %2032 = vst [vmem:[%s3058_s9 + $0x98] sm:$0xff] %v2397_v31  ;;  %v1383_v43 = vmul.f32 %v3019_v55, %v1219_v33  ;;  %v1075_v45 = vadd.f32 %v1074_v15, %v3009_v40  ;;  %v1542_v50 = vadd.f32 %v3032_v2, %v1378_v36  ;;  %v1218_v52 = vmax.f32 %v878_v39, 0.0 }
 0x141   : > { %v1544_v51 = vadd.f32 %v3034_v3, %v1380_v37  ;;  %v1220_v54 = vmax.f32 %v1071_v41, 0.0  ;;  %v1545_v58 = vadd.f32 %v3021_v56, %v1381_v42  ;;  %v1221_v62 = vmax.f32 %v882_v44, 0.0  ;;  %v891_v0 = vpop.f32.mrf.mxu0  ;;  %v1084_v1 = vpop.f32.mrf.mxu1 }
 0x142   : > { %v1547_v60 = vadd.f32 %v3023_v57, %v1383_v43  ;;  %v1223_v63 = vmax.f32 %v1075_v45, 0.0  ;;  %v2398_v4 = vpack.c.bf16 %v1542_v50, %v1541_v26  ;;  %v1382_v6 = vmul.f32 %v3025_v59, %v1218_v52 }
 0x143   : > { %v2399_v5 = vpack.c.bf16 %v1544_v51, %v1543_v27  ;;  %v1384_v7 = vmul.f32 %v3027_v61, %v1220_v54  ;;  %v1385_v8 = vmul.f32 %v3016_v53, %v1221_v62  ;;  %v884_v10 = vadd.f32 %v883_v24, %v3011_v46  ;;  %v893_v12 = vpop.f32.mrf.mxu0  ;;  %v1086_v13 = vpop.f32.mrf.mxu1 }
 0x144   : > { %v1387_v9 = vmul.f32 %v3019_v55, %v1223_v63  ;;  %v1077_v11 = vadd.f32 %v1076_v25, %v3013_v47  ;;  %2033 = vst [vmem:[%s3058_s9 + $0xa0] sm:$0xff] %v2398_v4  ;;  %v1546_v14 = vadd.f32 %v3032_v2, %v1382_v6  ;;  %v886_v16 = vadd.f32 %v885_v34, %v3007_v38 }
 0x145   : > { %2034 = vst [vmem:[%s3058_s9 + $0xa8] sm:$0xff] %v2399_v5  ;;  %v1548_v15 = vadd.f32 %v3034_v3, %v1384_v7  ;;  %v1079_v17 = vadd.f32 %v1078_v35, %v3009_v40  ;;  %v1549_v18 = vadd.f32 %v3021_v56, %v1385_v8  ;;  %v1222_v20 = vmax.f32 %v884_v10, 0.0  ;;  %v895_v22 = vpop.f32.mrf.mxu0  ;;  %v1088_v23 = vpop.f32.mrf.mxu1 }
 0x146   : > { %v1551_v19 = vadd.f32 %v3023_v57, %v1387_v9  ;;  %v1224_v21 = vmax.f32 %v1077_v11, 0.0  ;;  %v2400_v24 = vpack.c.bf16 %v1546_v14, %v1545_v58  ;;  %v1225_v26 = vmax.f32 %v886_v16, 0.0 }
 0x147   : > { %v2401_v25 = vpack.c.bf16 %v1548_v15, %v1547_v60  ;;  %v1227_v27 = vmax.f32 %v1079_v17, 0.0  ;;  %v1386_v28 = vmul.f32 %v3025_v59, %v1222_v20  ;;  %v888_v30 = vadd.f32 %v887_v48, %v3011_v46  ;;  %v897_v32 = vpop.f32.mrf.mxu0  ;;  %v1090_v33 = vpop.f32.mrf.mxu1 }
 0x148   : > { %v1388_v29 = vmul.f32 %v3027_v61, %v1224_v21  ;;  %v1081_v31 = vadd.f32 %v1080_v49, %v3013_v47  ;;  %2035 = vst [vmem:[%s3058_s9 + $0xb0] sm:$0xff] %v2400_v24  ;;  %v1389_v34 = vmul.f32 %v3016_v53, %v1225_v26  ;;  %v892_v36 = vadd.f32 %v891_v0, %v3007_v38 }
 0x149   : > { %2036 = vst [vmem:[%s3058_s9 + $0xb8] sm:$0xff] %v2401_v25  ;;  %v1391_v35 = vmul.f32 %v3019_v55, %v1227_v27  ;;  %v1085_v37 = vadd.f32 %v1084_v1, %v3009_v40  ;;  %v1550_v39 = vadd.f32 %v3032_v2, %v1386_v28  ;;  %v1226_v42 = vmax.f32 %v888_v30, 0.0  ;;  %v901_v44 = vpop.f32.mrf.mxu0  ;;  %v1094_v45 = vpop.f32.mrf.mxu1 }
 0x14a   : > { %v1552_v41 = vadd.f32 %v3034_v3, %v1388_v29  ;;  %v1228_v43 = vmax.f32 %v1081_v31, 0.0  ;;  %v1553_v48 = vadd.f32 %v3021_v56, %v1389_v34  ;;  %v1229_v50 = vmax.f32 %v892_v36, 0.0 }
 0x14b   : > { %v1555_v49 = vadd.f32 %v3023_v57, %v1391_v35  ;;  %v1231_v51 = vmax.f32 %v1085_v37, 0.0  ;;  %v2402_v52 = vpack.c.bf16 %v1550_v39, %v1549_v18  ;;  %v1390_v58 = vmul.f32 %v3025_v59, %v1226_v42  ;;  %v903_v62 = vpop.f32.mrf.mxu0  ;;  %v1096_v63 = vpop.f32.mrf.mxu1 }
 0x14c   : > { %v2403_v54 = vpack.c.bf16 %v1552_v41, %v1551_v19  ;;  %v1392_v60 = vmul.f32 %v3027_v61, %v1228_v43  ;;  %v1393_v0 = vmul.f32 %v3016_v53, %v1229_v50  ;;  %v894_v4 = vadd.f32 %v893_v12, %v3011_v46 }
 0x14d   : > { %v1395_v1 = vmul.f32 %v3019_v55, %v1231_v51  ;;  %v1087_v5 = vadd.f32 %v1086_v13, %v3013_v47  ;;  %2037 = vst [vmem:[%s3058_s9 + $0xc0] sm:$0xff] %v2402_v52  ;;  %v1554_v6 = vadd.f32 %v3032_v2, %v1390_v58  ;;  %v896_v8 = vadd.f32 %v895_v22, %v3007_v38  ;;  %v905_v10 = vpop.f32.mrf.mxu0  ;;  %v1098_v11 = vpop.f32.mrf.mxu1 }
 0x14e   : > { %2038 = vst [vmem:[%s3058_s9 + $0xc8] sm:$0xff] %v2403_v54  ;;  %v1556_v7 = vadd.f32 %v3034_v3, %v1392_v60  ;;  %v1089_v9 = vadd.f32 %v1088_v23, %v3009_v40  ;;  %v1557_v14 = vadd.f32 %v3021_v56, %v1393_v0  ;;  %v1230_v15 = vmax.f32 %v894_v4, 0.0 }
 0x14f   : > { %v1559_v12 = vadd.f32 %v3023_v57, %v1395_v1  ;;  %v1232_v13 = vmax.f32 %v1087_v5, 0.0  ;;  %v2404_v16 = vpack.c.bf16 %v1554_v6, %v1553_v48  ;;  %v1233_v18 = vmax.f32 %v896_v8, 0.0  ;;  %v907_v20 = vpop.f32.mrf.mxu0  ;;  %v1100_v21 = vpop.f32.mrf.mxu1 }
 0x150   : > { %v2405_v17 = vpack.c.bf16 %v1556_v7, %v1555_v49  ;;  %v1235_v19 = vmax.f32 %v1089_v9, 0.0  ;;  %v1394_v22 = vmul.f32 %v3025_v59, %v1230_v15  ;;  %v898_v24 = vadd.f32 %v897_v32, %v3011_v46 }
 0x151   : > { %v1396_v23 = vmul.f32 %v3027_v61, %v1232_v13  ;;  %v1091_v25 = vadd.f32 %v1090_v33, %v3013_v47  ;;  %2039 = vst [vmem:[%s3058_s9 + $0xd0] sm:$0xff] %v2404_v16  ;;  %v1397_v26 = vmul.f32 %v3016_v53, %v1233_v18  ;;  %v902_v28 = vadd.f32 %v901_v44, %v3007_v38  ;;  %v911_v30 = vpop.f32.mrf.mxu0  ;;  %v1104_v31 = vpop.f32.mrf.mxu1 }
 0x152   : > { %2040 = vst [vmem:[%s3058_s9 + $0xd8] sm:$0xff] %v2405_v17  ;;  %v1399_v27 = vmul.f32 %v3019_v55, %v1235_v19  ;;  %v1095_v29 = vadd.f32 %v1094_v45, %v3009_v40  ;;  %v1558_v34 = vadd.f32 %v3032_v2, %v1394_v22  ;;  %v1234_v36 = vmax.f32 %v898_v24, 0.0 }
 0x153   : > { %v1560_v35 = vadd.f32 %v3034_v3, %v1396_v23  ;;  %v1236_v32 = vmax.f32 %v1091_v25, 0.0  ;;  %v1561_v33 = vadd.f32 %v3021_v56, %v1397_v26  ;;  %v1237_v39 = vmax.f32 %v902_v28, 0.0  ;;  %v913_v42 = vpop.f32.mrf.mxu0  ;;  %v1106_v43 = vpop.f32.mrf.mxu1 }
 0x154   : > { %v1563_v37 = vadd.f32 %v3023_v57, %v1399_v27  ;;  %v1239_v41 = vmax.f32 %v1095_v29, 0.0  ;;  %v2406_v44 = vpack.c.bf16 %v1558_v34, %v1557_v14  ;;  %v1398_v48 = vmul.f32 %v3025_v59, %v1234_v36 }
 0x155   : > { %v2407_v45 = vpack.c.bf16 %v1560_v35, %v1559_v12  ;;  %v1400_v49 = vmul.f32 %v3027_v61, %v1236_v32  ;;  %v1401_v50 = vmul.f32 %v3016_v53, %v1237_v39  ;;  %v904_v52 = vadd.f32 %v903_v62, %v3011_v46  ;;  %v915_v58 = vpop.f32.mrf.mxu0  ;;  %v1108_v60 = vpop.f32.mrf.mxu1 }
 0x156   : > { %v1403_v51 = vmul.f32 %v3019_v55, %v1239_v41  ;;  %v1097_v54 = vadd.f32 %v1096_v63, %v3013_v47  ;;  %2041 = vst [vmem:[%s3058_s9 + $0xe0] sm:$0xff] %v2406_v44  ;;  %v1562_v0 = vadd.f32 %v3032_v2, %v1398_v48  ;;  %v906_v4 = vadd.f32 %v905_v10, %v3007_v38 }
 0x157   : > { %2042 = vst [vmem:[%s3058_s9 + $0xe8] sm:$0xff] %v2407_v45  ;;  %v1564_v1 = vadd.f32 %v3034_v3, %v1400_v49  ;;  %v1099_v5 = vadd.f32 %v1098_v11, %v3009_v40  ;;  %v1565_v6 = vadd.f32 %v3021_v56, %v1401_v50  ;;  %v1238_v62 = vmax.f32 %v904_v52, 0.0  ;;  %v917_v8 = vpop.f32.mrf.mxu0  ;;  %v1110_v9 = vpop.f32.mrf.mxu1 }
 0x158   : > { %v1567_v7 = vadd.f32 %v3023_v57, %v1403_v51  ;;  %v1240_v63 = vmax.f32 %v1097_v54, 0.0  ;;  %v2408_v14 = vpack.c.bf16 %v1562_v0, %v1561_v33  ;;  %v1241_v15 = vmax.f32 %v906_v4, 0.0 }
 0x159   : > { %v2409_v12 = vpack.c.bf16 %v1564_v1, %v1563_v37  ;;  %v1243_v13 = vmax.f32 %v1099_v5, 0.0  ;;  %v1402_v16 = vmul.f32 %v3025_v59, %v1238_v62  ;;  %v908_v11 = vadd.f32 %v907_v20, %v3011_v46  ;;  %v921_v18 = vpop.f32.mrf.mxu0  ;;  %v1114_v19 = vpop.f32.mrf.mxu1 }
 0x15a   : > { %v1404_v10 = vmul.f32 %v3027_v61, %v1240_v63  ;;  %v1101_v17 = vadd.f32 %v1100_v21, %v3013_v47  ;;  %2043 = vst [vmem:[%s3058_s9 + $0xf0] sm:$0xff] %v2408_v14  ;;  %v1405_v22 = vmul.f32 %v3016_v53, %v1241_v15  ;;  %v912_v24 = vadd.f32 %v911_v30, %v3007_v38 }
 0x15b   : > { %2044 = vst [vmem:[%s3058_s9 + $0xf8] sm:$0xff] %v2409_v12  ;;  %v1407_v23 = vmul.f32 %v3019_v55, %v1243_v13  ;;  %v1105_v25 = vadd.f32 %v1104_v31, %v3009_v40  ;;  %v1566_v26 = vadd.f32 %v3032_v2, %v1402_v16  ;;  %v1242_v28 = vmax.f32 %v908_v11, 0.0  ;;  %v923_v29 = vpop.f32.mrf.mxu0  ;;  %v1116_v21 = vpop.f32.mrf.mxu1 }
 0x15c   : > { %v1568_v27 = vadd.f32 %v3034_v3, %v1404_v10  ;;  %v1244_v20 = vmax.f32 %v1101_v17, 0.0  ;;  %v1569_v34 = vadd.f32 %v3021_v56, %v1405_v22  ;;  %v1245_v36 = vmax.f32 %v912_v24, 0.0 }
 0x15d   : > { %v1571_v35 = vadd.f32 %v3023_v57, %v1407_v23  ;;  %v1247_v32 = vmax.f32 %v1105_v25, 0.0  ;;  %v2410_v33 = vpack.c.bf16 %v1566_v26, %v1565_v6  ;;  %v1406_v31 = vmul.f32 %v3025_v59, %v1242_v28  ;;  %v925_v39 = vpop.f32.mrf.mxu0  ;;  %v1118_v41 = vpop.f32.mrf.mxu1 }
 0x15e   : > { %v2411_v30 = vpack.c.bf16 %v1568_v27, %v1567_v7  ;;  %v1408_v37 = vmul.f32 %v3027_v61, %v1244_v20  ;;  %v1409_v44 = vmul.f32 %v3016_v53, %v1245_v36  ;;  %v914_v48 = vadd.f32 %v913_v42, %v3011_v46 }
 0x15f   : > { %v1411_v45 = vmul.f32 %v3019_v55, %v1247_v32  ;;  %v1107_v49 = vadd.f32 %v1106_v43, %v3013_v47  ;;  %2045 = vst [vmem:[%s3058_s9 + $0x100] sm:$0xff] %v2410_v33  ;;  %v1570_v50 = vadd.f32 %v3032_v2, %v1406_v31  ;;  %v916_v52 = vadd.f32 %v915_v58, %v3007_v38  ;;  %v927_v0 = vpop.f32.mrf.mxu0  ;;  %v1120_v1 = vpop.f32.mrf.mxu1 }
 0x160   : > { %2046 = vst [vmem:[%s3058_s9 + $0x108] sm:$0xff] %v2411_v30  ;;  %v1572_v51 = vadd.f32 %v3034_v3, %v1408_v37  ;;  %v1109_v54 = vadd.f32 %v1108_v60, %v3009_v40  ;;  %v1573_v4 = vadd.f32 %v3021_v56, %v1409_v44  ;;  %v1246_v5 = vmax.f32 %v914_v48, 0.0 }
 0x161   : > { %v1575_v42 = vadd.f32 %v3023_v57, %v1411_v45  ;;  %v1248_v43 = vmax.f32 %v1107_v49, 0.0  ;;  %v2412_v6 = vpack.c.bf16 %v1570_v50, %v1569_v34  ;;  %v1249_v62 = vmax.f32 %v916_v52, 0.0  ;;  %v931_v14 = vpop.f32.mrf.mxu0  ;;  %v1124_v12 = vpop.f32.mrf.mxu1 }
 0x162   : > { %v2413_v7 = vpack.c.bf16 %v1572_v51, %v1571_v35  ;;  %v1251_v63 = vmax.f32 %v1109_v54, 0.0  ;;  %v1410_v58 = vmul.f32 %v3025_v59, %v1246_v5  ;;  %v918_v15 = vadd.f32 %v917_v8, %v3011_v46 }
 0x163   : > { %v1412_v60 = vmul.f32 %v3027_v61, %v1248_v43  ;;  %v1111_v13 = vadd.f32 %v1110_v9, %v3013_v47  ;;  %2047 = vst [vmem:[%s3058_s9 + $0x110] sm:$0xff] %v2412_v6  ;;  %v1413_v16 = vmul.f32 %v3016_v53, %v1249_v62  ;;  %v922_v11 = vadd.f32 %v921_v18, %v3007_v38  ;;  %v3306_v22 = vpop.f32.mrf.mxu0  ;;  %v3308_v23 = vpop.f32.mrf.mxu1 }
 0x164   : > { %2048 = vst [vmem:[%s3058_s9 + $0x118] sm:$0xff] %v2413_v7  ;;  %v1415_v10 = vmul.f32 %v3019_v55, %v1251_v63  ;;  %v1115_v17 = vadd.f32 %v1114_v19, %v3009_v40  ;;  %v1574_v24 = vadd.f32 %v3032_v2, %v1410_v58  ;;  %v1250_v25 = vmax.f32 %v918_v15, 0.0 }
 0x165   : > { %v1576_v8 = vadd.f32 %v3034_v3, %v1412_v60  ;;  %v1252_v9 = vmax.f32 %v1111_v13, 0.0  ;;  %v1577_v26 = vadd.f32 %v3021_v56, %v1413_v16  ;;  %v1253_v28 = vmax.f32 %v922_v11, 0.0  ;;  %v3314_v20 = vpop.f32.mrf.mxu0  ;;  %v3316_v19 = vpop.f32.mrf.mxu1 }
 0x166   : > { %v1579_v27 = vadd.f32 %v3023_v57, %v1415_v10  ;;  %v1255_v18 = vmax.f32 %v1115_v17, 0.0  ;;  %v2414_v34 = vpack.c.bf16 %v1574_v24, %v1573_v4  ;;  %v1414_v36 = vmul.f32 %v3025_v59, %v1250_v25 }
 0x167   : > { %v2415_v35 = vpack.c.bf16 %v1576_v8, %v1575_v42  ;;  %v1416_v32 = vmul.f32 %v3027_v61, %v1252_v9  ;;  %v1417_v33 = vmul.f32 %v3016_v53, %v1253_v28  ;;  %v924_v31 = vadd.f32 %v923_v29, %v3011_v46  ;;  %v3324_v44 = vpop.f32.mrf.mxu0  ;;  %v3326_v45 = vpop.f32.mrf.mxu1 }
 0x168   : > { %v1419_v30 = vmul.f32 %v3019_v55, %v1255_v18  ;;  %v1117_v37 = vadd.f32 %v1116_v21, %v3013_v47  ;;  %2049 = vst [vmem:[%s3058_s9 + $0x120] sm:$0xff] %v2414_v34  ;;  %v1578_v48 = vadd.f32 %v3032_v2, %v1414_v36  ;;  %v926_v50 = vadd.f32 %v925_v39, %v3007_v38 }
 0x169   : > { %2050 = vst [vmem:[%s3058_s9 + $0x128] sm:$0xff] %v2415_v35  ;;  %v1580_v49 = vadd.f32 %v3034_v3, %v1416_v32  ;;  %v1119_v51 = vadd.f32 %v1118_v41, %v3009_v40  ;;  %v1581_v52 = vadd.f32 %v3021_v56, %v1417_v33  ;;  %v1254_v21 = vmax.f32 %v924_v31, 0.0  ;;  %v3336_v4 = vpop.f32.mrf.mxu0  ;;  %v3338_v42 = vpop.f32.mrf.mxu1 }
 0x16a   : > { %v1583_v29 = vadd.f32 %v3023_v57, %v1419_v30  ;;  %v1256_v54 = vmax.f32 %v1117_v37, 0.0  ;;  %v2416_v5 = vpack.c.bf16 %v1578_v48, %v1577_v26  ;;  %v1257_v6 = vmax.f32 %v926_v50, 0.0 }
 0x16b   : > { %v2417_v43 = vpack.c.bf16 %v1580_v49, %v1579_v27  ;;  %v1259_v7 = vmax.f32 %v1119_v51, 0.0  ;;  %v1418_v39 = vmul.f32 %v3025_v59, %v1254_v21  ;;  %v928_v62 = vadd.f32 %v927_v0, %v3011_v46  ;;  %v3344_v58 = vpop.f32.mrf.mxu0  ;;  %v3346_v60 = vpop.f32.mrf.mxu1 }
 0x16c   : > { %v1420_v41 = vmul.f32 %v3027_v61, %v1256_v54  ;;  %v1121_v63 = vadd.f32 %v1120_v1, %v3013_v47  ;;  %2051 = vst [vmem:[%s3058_s9 + $0x130] sm:$0xff] %v2416_v5  ;;  %v1421_v15 = vmul.f32 %v3016_v53, %v1257_v6  ;;  %v932_v16 = vadd.f32 %v931_v14, %v3007_v38 }
 0x16d   : > { %2052 = vst [vmem:[%s3058_s9 + $0x138] sm:$0xff] %v2417_v43  ;;  %v1423_v13 = vmul.f32 %v3019_v55, %v1259_v7  ;;  %v1125_v10 = vadd.f32 %v1124_v12, %v3009_v40  ;;  %v1582_v11 = vadd.f32 %v3032_v2, %v1418_v39  ;;  %v1258_v17 = vmax.f32 %v928_v62, 0.0  ;;  %v3356_v24 = vpop.f32.mrf.mxu0  ;;  %v3358_v8 = vpop.f32.mrf.mxu1 }
 0x16e   : > { %v1584_v0 = vadd.f32 %v3034_v3, %v1420_v41  ;;  %v1260_v1 = vmax.f32 %v1121_v63, 0.0  ;;  %v1585_v25 = vadd.f32 %v3021_v56, %v1421_v15  ;;  %v1261_v26 = vmax.f32 %v932_v16, 0.0 }
 0x16f   : > { %v1587_v9 = vadd.f32 %v3023_v57, %v1423_v13  ;;  %v1263_v14 = vmax.f32 %v1125_v10, 0.0  ;;  %v2418_v27 = vpack.c.bf16 %v1582_v11, %v1581_v52  ;;  %v1422_v28 = vmul.f32 %v3025_v59, %v1258_v17  ;;  %v3364_v34 = vpop.f32.mrf.mxu0  ;;  %v3366_v35 = vpop.f32.mrf.mxu1 }
 0x170   : > { %v2419_v12 = vpack.c.bf16 %v1584_v0, %v1583_v29  ;;  %v1424_v18 = vmul.f32 %v3027_v61, %v1260_v1  ;;  %v1425_v36 = vmul.f32 %v3016_v53, %v1261_v26  ;;  %v934_v33 = vadd.f32 %v3306_v22, %v3011_v46 }
 0x171   : > { %v1427_v32 = vmul.f32 %v3019_v55, %v1263_v14  ;;  %v1127_v30 = vadd.f32 %v3308_v23, %v3013_v47  ;;  %2053 = vst [vmem:[%s3058_s9 + $0x140] sm:$0xff] %v2418_v27  ;;  %v1586_v31 = vadd.f32 %v3032_v2, %v1422_v28  ;;  %v936_v48 = vadd.f32 %v3314_v20, %v3007_v38  ;;  %v3382_v50 = vpop.f32.mrf.mxu0  ;;  %v3384_v51 = vpop.f32.mrf.mxu1 }
 0x172   : > { %2054 = vst [vmem:[%s3058_s9 + $0x148] sm:$0xff] %v2419_v12  ;;  %v1588_v37 = vadd.f32 %v3034_v3, %v1424_v18  ;;  %v1129_v49 = vadd.f32 %v3316_v19, %v3009_v40  ;;  %v1589_v22 = vadd.f32 %v3021_v56, %v1425_v36  ;;  %v1262_v52 = vmax.f32 %v934_v33, 0.0 }
 0x173   : > { %v1591_v23 = vadd.f32 %v3023_v57, %v1427_v32  ;;  %v1264_v29 = vmax.f32 %v1127_v30, 0.0  ;;  %v2420_v21 = vpack.c.bf16 %v1586_v31, %v1585_v25  ;;  %v1265_v5 = vmax.f32 %v936_v48, 0.0  ;;  %v3388_v20 = vpop.f32.mrf.mxu0  ;;  %v3390_v6 = vpop.f32.mrf.mxu1 }
 0x174   : > { %v2421_v54 = vpack.c.bf16 %v1588_v37, %v1587_v9  ;;  %v1267_v43 = vmax.f32 %v1129_v49, 0.0  ;;  %v1426_v19 = vmul.f32 %v3025_v59, %v1262_v52  ;;  %v938_v39 = vadd.f32 %v3324_v44, %v3011_v46 }
 0x175   : > { %v1428_v7 = vmul.f32 %v3027_v61, %v1264_v29  ;;  %v1131_v41 = vadd.f32 %v3326_v45, %v3013_v47  ;;  %2055 = vst [vmem:[%s3058_s9 + $0x150] sm:$0xff] %v2420_v21  ;;  %v1429_v62 = vmul.f32 %v3016_v53, %v1265_v5  ;;  %v942_v15 = vadd.f32 %v3336_v4, %v3007_v38  ;;  %v3406_v16 = vpop.f32.mrf.mxu0  ;;  %v3408_v10 = vpop.f32.mrf.mxu1 }
 0x176   : > { %2056 = vst [vmem:[%s3058_s9 + $0x158] sm:$0xff] %v2421_v54  ;;  %v1431_v63 = vmul.f32 %v3019_v55, %v1267_v43  ;;  %v1135_v13 = vadd.f32 %v3338_v42, %v3009_v40  ;;  %v1590_v44 = vadd.f32 %v3032_v2, %v1426_v19  ;;  %v1266_v11 = vmax.f32 %v938_v39, 0.0 }
 0x177   : > { %v1592_v45 = vadd.f32 %v3034_v3, %v1428_v7  ;;  %v1268_v0 = vmax.f32 %v1131_v41, 0.0  ;;  %v1593_v17 = vadd.f32 %v3021_v56, %v1429_v62  ;;  %v1269_v4 = vmax.f32 %v942_v15, 0.0  ;;  %v3414_v9 = vpop.f32.mrf.mxu0  ;;  %v3416_v42 = vpop.f32.mrf.mxu1 }
 0x178   : > { %v1595_v1 = vadd.f32 %v3023_v57, %v1431_v63  ;;  %v1271_v25 = vmax.f32 %v1135_v13, 0.0  ;;  %v2422_v26 = vpack.c.bf16 %v1590_v44, %v1589_v22  ;;  %v1430_v27 = vmul.f32 %v3025_v59, %v1266_v11 }
 0x179   : > { %v2423_v14 = vpack.c.bf16 %v1592_v45, %v1591_v23  ;;  %v1432_v12 = vmul.f32 %v3027_v61, %v1268_v0  ;;  %v1433_v28 = vmul.f32 %v3016_v53, %v1269_v4  ;;  %v944_v36 = vadd.f32 %v3344_v58, %v3011_v46  ;;  %v3426_v33 = vpop.f32.mrf.mxu0  ;;  %v3428_v30 = vpop.f32.mrf.mxu1 }
 0x17a   : > { %v1435_v18 = vmul.f32 %v3019_v55, %v1271_v25  ;;  %v1137_v32 = vadd.f32 %v3346_v60, %v3013_v47  ;;  %2057 = vst [vmem:[%s3058_s9 + $0x160] sm:$0xff] %v2422_v26  ;;  %v1594_v31 = vadd.f32 %v3032_v2, %v1430_v27  ;;  %v946_v48 = vadd.f32 %v3356_v24, %v3007_v38 }
 0x17b   : > { %2058 = vst [vmem:[%s3058_s9 + $0x168] sm:$0xff] %v2423_v14  ;;  %v1596_v37 = vadd.f32 %v3034_v3, %v1432_v12  ;;  %v1139_v58 = vadd.f32 %v3358_v8, %v3009_v40  ;;  %v1597_v60 = vadd.f32 %v3021_v56, %v1433_v28  ;;  %v1270_v22 = vmax.f32 %v944_v36, 0.0  ;;  %v3446_v19 = vpop.f32.mrf.mxu0  ;;  %v3448_v7 = vpop.f32.mrf.mxu1 }
 0x17c   : > { %v1599_v49 = vadd.f32 %v3023_v57, %v1435_v18  ;;  %v1272_v23 = vmax.f32 %v1137_v32, 0.0  ;;  %v2424_v52 = vpack.c.bf16 %v1594_v31, %v1593_v17  ;;  %v1273_v21 = vmax.f32 %v946_v48, 0.0 }
 0x17d   : > { %v2425_v29 = vpack.c.bf16 %v1596_v37, %v1595_v1  ;;  %v1275_v54 = vmax.f32 %v1139_v58, 0.0  ;;  %v1434_v5 = vmul.f32 %v3025_v59, %v1270_v22  ;;  %v948_v24 = vadd.f32 %v3364_v34, %v3011_v46  ;;  %v965_v4 = vpop.f32.mrf.mxu0  ;;  %v1158_v25 = vpop.f32.mrf.mxu1 }
 0x17e   : > { %v1436_v43 = vmul.f32 %v3027_v61, %v1272_v23  ;;  %v1141_v8 = vadd.f32 %v3366_v35, %v3013_v47  ;;  %2059 = vst [vmem:[%s3058_s9 + $0x170] sm:$0xff] %v2424_v52  ;;  %v1437_v39 = vmul.f32 %v3016_v53, %v1273_v21  ;;  %v952_v62 = vadd.f32 %v3382_v50, %v3007_v38 }
 0x17f   : > { %2060 = vst [vmem:[%s3058_s9 + $0x178] sm:$0xff] %v2425_v29  ;;  %v1439_v41 = vmul.f32 %v3019_v55, %v1275_v54  ;;  %v1145_v63 = vadd.f32 %v3384_v51, %v3009_v40  ;;  %v1598_v34 = vadd.f32 %v3032_v2, %v1434_v5  ;;  %v1274_v15 = vmax.f32 %v948_v24, 0.0  ;;  %v967_v22 = vpop.f32.mrf.mxu0  ;;  %v1160_v23 = vpop.f32.mrf.mxu1 }
 0x180   : > { %v1600_v35 = vadd.f32 %v3034_v3, %v1436_v43  ;;  %v1276_v13 = vmax.f32 %v1141_v8, 0.0  ;;  %v1601_v44 = vadd.f32 %v3021_v56, %v1437_v39  ;;  %v1277_v11 = vmax.f32 %v952_v62, 0.0 }
 0x181   : > { %v1603_v45 = vadd.f32 %v3023_v57, %v1439_v41  ;;  %v1279_v0 = vmax.f32 %v1145_v63, 0.0  ;;  %v2426_v17 = vpack.c.bf16 %v1598_v34, %v1597_v60  ;;  %v1438_v50 = vmul.f32 %v3025_v59, %v1274_v15  ;;  %v971_v34 = vpop.f32.mrf.mxu0 }
 0x182   : > { %v2427_v1 = vpack.c.bf16 %v1600_v35, %v1599_v49  ;;  %v1440_v51 = vmul.f32 %v3027_v61, %v1276_v13  ;;  %v1441_v26 = vmul.f32 %v3016_v53, %v1277_v11  ;;  %v954_v27 = vadd.f32 %v3388_v20, %v3011_v46  ;;  %v1164_v35 = vpop.f32.mrf.mxu1 }
 0x183   : > { %v1443_v14 = vmul.f32 %v3019_v55, %v1279_v0  ;;  %v1147_v12 = vadd.f32 %v3390_v6, %v3013_v47  ;;  %2061 = vst [vmem:[%s3058_s9 + $0x180] sm:$0xff] %v2426_v17  ;;  %v1602_v28 = vadd.f32 %v3032_v2, %v1438_v50  ;;  %v956_v36 = vadd.f32 %v3406_v16, %v3007_v38 }
 0x184   : > { %2062 = vst [vmem:[%s3058_s9 + $0x188] sm:$0xff] %v2427_v1  ;;  %v1604_v18 = vadd.f32 %v3034_v3, %v1440_v51  ;;  %v1149_v32 = vadd.f32 %v3408_v10, %v3009_v40  ;;  %v1605_v31 = vadd.f32 %v3021_v56, %v1441_v26  ;;  %v1278_v37 = vmax.f32 %v954_v27, 0.0 }
 0x185   : > { %v1607_v20 = vadd.f32 %v3023_v57, %v1443_v14  ;;  %v1280_v6 = vmax.f32 %v1147_v12, 0.0  ;;  %v2428_v48 = vpack.c.bf16 %v1602_v28, %v1601_v44  ;;  %v1281_v60 = vmax.f32 %v956_v36, 0.0  ;;  %v973_v12 = vpop.f32.mrf.mxu0 }
 0x186   : > { %v2429_v58 = vpack.c.bf16 %v1604_v18, %v1603_v45  ;;  %v1283_v49 = vmax.f32 %v1149_v32, 0.0  ;;  %v1442_v52 = vmul.f32 %v3025_v59, %v1278_v37  ;;  %v958_v10 = vadd.f32 %v3414_v9, %v3011_v46 }
 0x187   : > { %v1444_v16 = vmul.f32 %v3027_v61, %v1280_v6  ;;  %v1151_v29 = vadd.f32 %v3416_v42, %v3013_v47  ;;  %2063 = vst [vmem:[%s3058_s9 + $0x190] sm:$0xff] %v2428_v48  ;;  %v1445_v21 = vmul.f32 %v3016_v53, %v1281_v60  ;;  %v962_v5 = vadd.f32 %v3426_v33, %v3007_v38 }
 0x188   : > { %2064 = vst [vmem:[%s3058_s9 + $0x198] sm:$0xff] %v2429_v58  ;;  %v1447_v54 = vmul.f32 %v3019_v55, %v1283_v49  ;;  %v1155_v43 = vadd.f32 %v3428_v30, %v3009_v40  ;;  %v1606_v24 = vadd.f32 %v3032_v2, %v1442_v52  ;;  %v1282_v9 = vmax.f32 %v958_v10, 0.0 }
 0x189   : > { %v1608_v8 = vadd.f32 %v3034_v3, %v1444_v16  ;;  %v1284_v39 = vmax.f32 %v1151_v29, 0.0  ;;  %v1609_v42 = vadd.f32 %v3021_v56, %v1445_v21  ;;  %v1285_v62 = vmax.f32 %v962_v5, 0.0 }
 0x18a   : > { %v1611_v41 = vadd.f32 %v3023_v57, %v1447_v54  ;;  %v1287_v63 = vmax.f32 %v1155_v43, 0.0  ;;  %v2430_v33 = vpack.c.bf16 %v1606_v24, %v1605_v31  ;;  %v1446_v30 = vmul.f32 %v3025_v59, %v1282_v9 }
 0x18b   : > { %v2431_v15 = vpack.c.bf16 %v1608_v8, %v1607_v20  ;;  %v1448_v13 = vmul.f32 %v3027_v61, %v1284_v39  ;;  %v1449_v44 = vmul.f32 %v3016_v53, %v1285_v62  ;;  %v964_v11 = vadd.f32 %v3446_v19, %v3011_v46 }
 0x18c   : > { %v1451_v45 = vmul.f32 %v3019_v55, %v1287_v63  ;;  %v1157_v0 = vadd.f32 %v3448_v7, %v3013_v47  ;;  %2065 = vst [vmem:[%s3058_s9 + $0x1a0] sm:$0xff] %v2430_v33  ;;  %v1610_v17 = vadd.f32 %v3032_v2, %v1446_v30  ;;  %v966_v50 = vadd.f32 %v965_v4, %v3007_v38  ;;  %v1166_v7 = vpop.f32.mrf.mxu1 }
 0x18d   : > { %2066 = vst [vmem:[%s3058_s9 + $0x1a8] sm:$0xff] %v2431_v15  ;;  %v1612_v1 = vadd.f32 %v3034_v3, %v1448_v13  ;;  %v1159_v51 = vadd.f32 %v1158_v25, %v3009_v40  ;;  %v1613_v26 = vadd.f32 %v3021_v56, %v1449_v44  ;;  %v1286_v19 = vmax.f32 %v964_v11, 0.0 }
 0x18e   : > { %v1615_v14 = vadd.f32 %v3023_v57, %v1451_v45  ;;  %v1288_v27 = vmax.f32 %v1157_v0, 0.0  ;;  %v2432_v28 = vpack.c.bf16 %v1610_v17, %v1609_v42  ;;  %v1289_v36 = vmax.f32 %v966_v50, 0.0 }
 0x18f   : > { %v2433_v18 = vpack.c.bf16 %v1612_v1, %v1611_v41  ;;  %v1291_v32 = vmax.f32 %v1159_v51, 0.0  ;;  %v1450_v31 = vmul.f32 %v3025_v59, %v1286_v19  ;;  %v968_v20 = vadd.f32 %v967_v22, %v3011_v46  ;;  %v975_v22 = vpop.f32.mrf.mxu0 }
 0x190   : > { %v1452_v4 = vmul.f32 %v3027_v61, %v1288_v27  ;;  %v1161_v25 = vadd.f32 %v1160_v23, %v3013_v47  ;;  %2067 = vst [vmem:[%s3058_s9 + $0x1b0] sm:$0xff] %v2432_v28  ;;  %v1453_v37 = vmul.f32 %v3016_v53, %v1289_v36  ;;  %v972_v48 = vadd.f32 %v971_v34, %v3007_v38  ;;  %v1168_v23 = vpop.f32.mrf.mxu1 }
 0x191   : > { %2068 = vst [vmem:[%s3058_s9 + $0x1b8] sm:$0xff] %v2433_v18  ;;  %v1455_v6 = vmul.f32 %v3019_v55, %v1291_v32  ;;  %v1165_v58 = vadd.f32 %v1164_v35, %v3009_v40  ;;  %v1614_v60 = vadd.f32 %v3032_v2, %v1450_v31  ;;  %v1290_v52 = vmax.f32 %v968_v20, 0.0  ;;  %v977_v33 = vpop.f32.mrf.mxu0 }
 0x192   : > { %v1616_v49 = vadd.f32 %v3034_v3, %v1452_v4  ;;  %v1292_v16 = vmax.f32 %v1161_v25, 0.0  ;;  %v1617_v10 = vadd.f32 %v3021_v56, %v1453_v37  ;;  %v1293_v21 = vmax.f32 %v972_v48, 0.0  ;;  %v1170_v15 = vpop.f32.mrf.mxu1 }
 0x193   : > { %v1619_v29 = vadd.f32 %v3023_v57, %v1455_v6  ;;  %v1295_v54 = vmax.f32 %v1165_v58, 0.0  ;;  %v2434_v5 = vpack.c.bf16 %v1614_v60, %v1613_v26  ;;  %v1454_v24 = vmul.f32 %v3025_v59, %v1290_v52 }
 0x194   : > { %v2435_v43 = vpack.c.bf16 %v1616_v49, %v1615_v14  ;;  %v1456_v8 = vmul.f32 %v3027_v61, %v1292_v16  ;;  %v1457_v9 = vmul.f32 %v3016_v53, %v1293_v21  ;;  %v974_v42 = vadd.f32 %v973_v12, %v3011_v46 }
 0x195   : > { %v1459_v39 = vmul.f32 %v3019_v55, %v1295_v54  ;;  %v1167_v41 = vadd.f32 %v1166_v7, %v3013_v47  ;;  %2069 = vst [vmem:[%s3058_s9 + $0x1c0] sm:$0xff] %v2434_v5  ;;  %v1618_v62 = vadd.f32 %v3032_v2, %v1454_v24  ;;  %v976_v34 = vadd.f32 %v975_v22, %v3007_v38 }
 0x196   : > { %2070 = vst [vmem:[%s3058_s9 + $0x1c8] sm:$0xff] %v2435_v43  ;;  %v1620_v63 = vadd.f32 %v3034_v3, %v1456_v8  ;;  %v1169_v35 = vadd.f32 %v1168_v23, %v3009_v40  ;;  %v1294_v30 = vmax.f32 %v974_v42, 0.0  ;;  %v978_v50 = vadd.f32 %v977_v33, %v3011_v46 }
 0x197   : > { %v1296_v13 = vmax.f32 %v1167_v41, 0.0  ;;  %v2436_v44 = vpack.c.bf16 %v1618_v62, %v1617_v10  ;;  %v1297_v11 = vmax.f32 %v976_v34, 0.0  ;;  %v1171_v51 = vadd.f32 %v1170_v15, %v3013_v47 }
 0x198   : > { %v2437_v45 = vpack.c.bf16 %v1620_v63, %v1619_v29  ;;  %v1299_v0 = vmax.f32 %v1169_v35, 0.0  ;;  %v1458_v17 = vmul.f32 %v3025_v59, %v1294_v30  ;;  %v1621_v38 = vadd.f32 %v3021_v56, %v1457_v9 }
 0x199   : > { %v1460_v1 = vmul.f32 %v3027_v61, %v1296_v13  ;;  %2071 = vst [vmem:[%s3058_s9 + $0x1d0] sm:$0xff] %v2436_v44  ;;  %v1623_v40 = vadd.f32 %v3023_v57, %v1459_v39  ;;  %v1461_v26 = vmul.f32 %v3016_v53, %v1297_v11  ;;  %v1298_v46 = vmax.f32 %v978_v50, 0.0 }
 0x19a   : > { %2072 = vst [vmem:[%s3058_s9 + $0x1d8] sm:$0xff] %v2437_v45  ;;  %v1463_v14 = vmul.f32 %v3019_v55, %v1299_v0  ;;  %v1622_v19 = vadd.f32 %v3032_v2, %v1458_v17  ;;  %v1300_v12 = vmax.f32 %v1171_v51, 0.0 }
 0x19b   : > { %v1624_v27 = vadd.f32 %v3034_v3, %v1460_v1  ;;  %v1462_v28 = vmul.f32 %v3025_v59, %v1298_v46  ;;  %v1625_v53 = vadd.f32 %v3021_v56, %v1461_v26 }
 0x19c   : > { %v2438_v47 = vpack.c.bf16 %v1622_v19, %v1621_v38  ;;  %v1464_v18 = vmul.f32 %v3027_v61, %v1300_v12  ;;  %v1627_v55 = vadd.f32 %v3023_v57, %v1463_v14 }
 0x19d   : > { %v2439_v7 = vpack.c.bf16 %v1624_v27, %v1623_v40  ;;  %v1626_v36 = vadd.f32 %v3032_v2, %v1462_v28 }
 0x19e   : > { %2073 = vst [vmem:[%s3058_s9 + $0x1e0] sm:$0xff] %v2438_v47  ;;  %v1628_v32 = vadd.f32 %v3034_v3, %v1464_v18 }
 0x19f   : > { %2074 = vst [vmem:[%s3058_s9 + $0x1e8] sm:$0xff] %v2439_v7  ;;  %v2440_v59 = vpack.c.bf16 %v1626_v36, %v1625_v53 }
 0x1a0   : > { %v2441_v61 = vpack.c.bf16 %v1628_v32, %v1627_v55 }
 0x1a1   : > { %2075 = vst [vmem:[%s3058_s9 + $0x1f0] sm:$0xff] %v2440_v59 }
 0x1a2   : > { %2076 = vst [vmem:[%s3058_s9 + $0x1f8] sm:$0xff] %v2441_v61 }
 0x1a3   : > { %2637 = shalt.err (!%p2634_p5)
}
 0x1a4   : > { %s2638_s30 = scalar_lea.hbm %s3565_s19, 8192  ;;  %s2642_s29 = scalar_lea.hbm %s3621_s3, 17408 }
 0x1a5   : > { %p2639_p6 = scmp.ne.s32.totalorder %s3565_s19, %s2638_s30  ;;  %p2643_p10 = scmp.lt.s32.totalorder %s3565_s19, %s3621_s3 }
 0x1a6   : > { %p2644_p11 = scmp.lt.s32.totalorder %s2642_s29, %s2638_s30 }
 0x1a7   : > { %p2640_p7 = pnand %p2639_p6, %p2765_p4 }
 0x1a8   : > { %p2645_p12 = por %p2644_p11, %p2643_p10 }
 0x1a9   : > { %p2641_p9 = pneg %p2640_p7 }
 0x1ab   : > { %p2646_p13 = pnand %p2645_p12, %p2641_p9 }
 0x1ad   : > { %2649 = shalt.err (!%p2646_p13)
}
 0x1ae   : > { %s2703_s8 = smov 256   ;;  %s2704_s9 = smov 16  }
 0x1af   : > { %2443 = dma.vmem_to_hbm [thread:$0]  (%p2765_p4), %s3567_s11, 8192, %s3565_s19, %s3573_s21, %s2703_s8, %s2703_s8, %s2704_s9  }
 0x1b0 PF: > { %p2449_p0 = scmp.ge.s32.totalorder %s2700_s17, 2  ;;  %s2116_s10 = sand.u32 1, %s2680_s12  }
 0x1b1   : > { %s2117_s15 = scalar_lea.sflag [#allocation3], %s2116_s10 }
 0x1b2   : > { %p2446_p1 = pnand %p2449_p0, %p2772_p8 }
 0x1b4   : > { %p2447_p2 = pneg %p2446_p1 }
 0x1b6   : > { %2675 = dma.done.wait (%p2447_p2), %s2117_s15, 8192  }
 0x1b7   : > { %2677 = vsyncadd (%p2447_p2), %s2117_s15, 4294959104  ;;  %s16_s17 = sadd.s32 1, %s2700_s17   ;;  %s3624_s12 = smov %s2684_s13 }
 0x1b8   : > { %p13_p3 = scmp.ge.s32.totalorder %s16_s17, 4   ;;  %s3625_s13 = smov %s2688_s14 }
 0x1b9   : > { %s3626_s14 = smov %s2778_s25  ;;  %s3627_s15 = smov %s2696_s16 }
 0x1ba   : > { %s3628_s16 = smov %s3630_s20  ;;  %15 = sbr.rel (!%p13_p3) target bundleno = 4 (0x4), region = 67 }
 0x1bf   :  { %2122 = vsyncpa [#allocation3], 1 }
 0x1c0   :  { %2124 = vsyncpa [#allocation3 + $0x1], 1 }

</bundles_post_ra>
